<compile_context>
chip_gen: v7x
topology: tpu7x:2x2x1
jax: 0.10.0
libtpu: 0.0.40
codegen_flags: <defaults>
</compile_context>

<pallas_src>
import functools
import itertools
import math

import jax
import jax.numpy as jnp
import numpy as np
from jax import lax
from jax.experimental import pallas as pl
from jax.experimental.pallas import tpu as pltpu


# ------------------------------- fused kernel --------------------------------
def _fused_mlp_kernel(x_ref, *refs, num_blocks, num_block_layers, use_skip):
    """refs = (w0, b0, w1, b1, ..., w_{L-1}, b_{L-1}, o_ref).

    Layer order: h1, block0 layer0..layerN-1, block1 ..., h2.
    Activations live as (C, Btile, D); weights are compact (C, Din, Dout) bf16;
    biases are (C, 1, Dout) f32.
    """
    o_ref = refs[-1]
    wb = refs[:-1]

    def layer(x, li, act="none", skip=None):
        w = wb[2 * li][...]        # (C, Din, Dout) bf16 — MXU-native operand
        b = wb[2 * li + 1][...]    # (C, 1, Dout)  f32
        # Batched per-channel matmul (C batches of (Bt,Din)@(Din,Dout)),
        # bf16 operands, f32 accumulation. No zero-padded block-diagonal.
        y = lax.dot_general(
            x.astype(jnp.bfloat16), w,
            dimension_numbers=(((2,), (1,)), ((0,), (0,))),
            preferred_element_type=jnp.float32,
        ) + b
        if skip is not None:
            y = y + skip
        if act == "relu":
            y = jnp.maximum(y, 0.0)
        elif act == "sigmoid":
            # Single EUP op (tanh) + one VPU FMA; overflow-safe for y << 0.
            y = 0.5 * jnp.tanh(0.5 * y) + 0.5
        return y

    x = x_ref[...].astype(jnp.float32)
    li = 0
    x = layer(x, li, act="relu")                      # h1
    li += 1
    for bi in range(num_blocks):
        x0 = x
        for _ in range(num_block_layers - 1):
            x = layer(x, li, act="relu")
            li += 1
        # torch does F.relu(mlp_blocks(X)) -> fuse that relu into the last
        # block's final layer; earlier blocks get no post-skip activation.
        act = "relu" if bi == num_blocks - 1 else "none"
        x = layer(x, li, act=act, skip=x0 if use_skip else None)
        li += 1
    x = layer(x, li, act="sigmoid")                   # h2
    o_ref[...] = x.astype(o_ref.dtype)


# ------------------------------- wrapper --------------------------------------
def _round_up(n, m):
    return ((n + m - 1) // m) * m


def _choose_batch_tile(batch):
    b8 = _round_up(max(batch, 1), 8)
    if b8 <= 8:
        return 8                                  # tiny batch: one full sublane tile
    # >= 2 grid steps so a v7x megacore can shard the batch axis; cap at 512
    # rows so v5e/v6e tiles stay big enough to amortize per-step overhead.
    return min(512, _round_up(-(-b8 // 2), 8))


def fused_mlp_forward(x, weights, biases, *, num_blocks, num_block_layers,
                      use_skip, batch_tile=None):
    """x: (C, B, in_dim) f32; weights[l]: (C, Din_l, Dout_l) bf16;
    biases[l]: (C, 1, Dout_l) f32.  Returns (C, B, out_dim) f32."""
    C, B, Din = x.shape
    Dout = weights[-1].shape[-1]

    if batch_tile is None:
        batch_tile = _choose_batch_tile(B)
    b_pad = _round_up(B, batch_tile)
    if b_pad != B:
        # Pad to full (8, lane) sublane tiles / full grid steps; sliced off below.
        x = jnp.pad(x, ((0, 0), (0, b_pad - B), (0, 0)))
    grid = (b_pad // batch_tile,)

    flat_args = []
    in_specs = [pl.BlockSpec((C, batch_tile, Din), lambda i: (0, i, 0))]
    for w, b in zip(weights, biases):
        flat_args += [w, b]
        # Whole-array, single-buffered VMEM residents: loaded once, reused by
        # every batch tile (no double-buffered pipeline copies of the weights).
        in_specs.append(pl.BlockSpec(memory_space=pltpu.MemorySpace.VMEM))
        in_specs.append(pl.BlockSpec(memory_space=pltpu.MemorySpace.VMEM))
    out_specs = pl.BlockSpec((C, batch_tile, Dout), lambda i: (0, i, 0))

    # Explicit VMEM budget: resident weights/biases + double-buffered x/out
    # tiles + a few live f32 intermediates; capped at 48 MiB (safe on v7x's
    # 64 MiB, well under v5e/v6e's 128 MiB).
    max_d = max(max(w.shape[1], w.shape[2]) for w in weights)
    need = (sum(w.size * w.dtype.itemsize for w in weights)
            + sum(b.size * b.dtype.itemsize for b in biases)
            + 2 * (C * batch_tile * Din * 4 + C * batch_tile * Dout * 4)
            + 4 * C * batch_tile * max_d * 4)
    vmem_limit = int(min(max(2 * need, 32 << 20), 48 << 20))

    kernel = functools.partial(
        _fused_mlp_kernel,
        num_blocks=num_blocks,
        num_block_layers=num_block_layers,
        use_skip=use_skip,
    )

    out = pl.pallas_call(
        kernel,
        out_shape=jax.ShapeDtypeStruct((C, b_pad, Dout), jnp.float32),
        grid_spec=pltpu.PrefetchScalarGridSpec(
            num_scalar_prefetch=0,
            grid=grid,
            in_specs=in_specs,
            out_specs=out_specs,
        ),
        compiler_params=pltpu.CompilerParams(
            dimension_semantics=("parallel",),    # batch tiles -> megacore/TCs
            vmem_limit_bytes=vmem_limit,
        ),
    )(x, *flat_args)
    return out[:, :B, :]


# --------------------------------- model ---------------------------------------
class MLPPallas:
    def __init__(self, cfg, key):
        self.num_zbins = cfg["num_zbins"]
        self.num_spectra = cfg["num_samples"] + math.comb(cfg["num_samples"], 2)
        self.num_ells = cfg["num_ells"]
        self.num_kbins = cfg["num_kbins"]
        self.num_cosmo = cfg["num_cosmo_params"]
        self.num_bias = cfg["num_bias_params"]
        self.use_skip = cfg["use_skip_connection"]
        self.num_blocks = cfg["num_mlp_blocks"]
        self.num_block_layers = cfg["num_block_layers"]
        self.C = self.num_zbins * self.num_spectra

        in_dim = self.num_cosmo + self.num_bias * 2
        out_dim = self.num_kbins * self.num_ells
        dims = cfg["mlp_dims"]
        C = self.C

        def init_layer(k, din, dout):
            k1, k2 = jax.random.split(k)
            scale = 1.0 / np.sqrt(din)
            w = jax.random.uniform(k1, (C, din, dout), jnp.float32, -scale, scale)
            b = jax.random.uniform(k2, (C, 1, dout), jnp.float32, -scale, scale)
            return w, b

        n_layers = 2 + self.num_blocks * self.num_block_layers
        keys = iter(jax.random.split(key, n_layers))

        # Layer order: h1, block0 layers..., block1 layers..., h2.
        # TODO(synk): blocks.block_parallel_resnet internals are not in the
        # provided source; assumed structure = num_block_layers per-channel
        # linears with ReLU between them, identity skip connection, and no
        # activation after the in-block skip add (except torch's final
        # F.relu on the last block's output).
        self.layers_cc = [init_layer(next(keys), in_dim, dims[0])]
        for i in range(self.num_blocks):
            for j in range(self.num_block_layers):
                din = dims[i]
                dout = dims[i] if j < self.num_block_layers - 1 else dims[i + 1]
                self.layers_cc.append(init_layer(next(keys), din, dout))
        self.layers_cc.append(init_layer(next(keys), dims[-1], out_dim))

        # Kernel-side parameters: compact per-channel bf16 weights (MXU-native
        # operand dtype, half the HBM DMA and resident VMEM), f32 biases.
        self.w_pc = [w.astype(jnp.bfloat16) for w, _ in self.layers_cc]
        self.b_pc = [b for _, b in self.layers_cc]

        # Static gather index replicating organize_params (incl. its quirks:
        # the outer zbin loop repeats identical assignments; the pairing
        # iterates over num_spectra with isample1 <= isample2).
        D = in_dim
        gidx = np.zeros((C, D), dtype=np.int32)
        mask = np.zeros((C,), dtype=np.float32)
        c = 0
        for i1, i2 in itertools.product(range(self.num_spectra), repeat=2):
            if i1 > i2 or c >= C:
                continue
            gidx[c, : self.num_cosmo] = np.arange(self.num_cosmo)
            c1 = self.num_cosmo + i1 * self.num_bias
            c2 = self.num_cosmo + i2 * self.num_bias
            gidx[c, self.num_cosmo::2] = np.arange(c1, c1 + self.num_bias)
            gidx[c, self.num_cosmo + 1::2] = np.arange(c2, c2 + self.num_bias)
            mask[c] = 1.0
            c += 1
        self._gidx = jnp.asarray(gidx)
        self._row_mask = jnp.asarray(mask)

    # ------------------------------------------------------------------ params
    def organize_params(self, params):
        """Single static gather equivalent to the torch per-row slice-assigns."""
        if self.C == 1:
            return params[:, None, :]              # torch returns params as-is
        x = params[:, self._gidx]                  # (B, C, D)
        return x * self._row_mask[None, :, None]   # rows beyond pairs stay 0

    # ----------------------------------------------------------------- forward
    def __call__(self, X, use_pallas=True):
        if not use_pallas:
            return self._ref_forward(X)
        x = self.organize_params(X)                # (B, C, D)
        x = jnp.transpose(x, (1, 0, 2))            # (C, B, D): channel = MXU batch dim
        y = fused_mlp_forward(
            x, self.w_pc, self.b_pc,
            num_blocks=self.num_blocks,
            num_block_layers=self.num_block_layers,
            use_skip=self.use_skip,
        )                                          # (C, B, out_dim)
        y = jnp.transpose(y, (1, 0, 2))            # (B, C, out_dim)
        return y.reshape(-1, self.num_zbins, self.num_spectra,
                         self.num_ells, self.num_kbins)

    # --------------------------------------------------------------- reference
    def _ref_forward(self, X):
        """Pure-JAX per-channel reference (HIGHEST-precision f32)."""
        x = self.organize_params(X)
        x = jnp.transpose(x, (1, 0, 2))            # (C, B, D)

        def lin(x, wb, skip=None, act="none"):
            w, b = wb
            y = jnp.einsum("cbi,cio->cbo", x, w,
                           precision=lax.Precision.HIGHEST) + b
            if skip is not None:
                y = y + skip
            if act == "relu":
                y = jnp.maximum(y, 0.0)
            elif act == "sigmoid":
                y = 1.0 / (1.0 + jnp.exp(-y))
            return y

        li = 0
        x = lin(x, self.layers_cc[li], act="relu"); li += 1
        for bi in range(self.num_blocks):
            x0 = x
            for _ in range(self.num_block_layers - 1):
                x = lin(x, self.layers_cc[li], act="relu"); li += 1
            act = "relu" if bi == self.num_blocks - 1 else "none"
            x = lin(x, self.layers_cc[li],
                    skip=x0 if self.use_skip else None, act=act); li += 1
        x = lin(x, self.layers_cc[li], act="sigmoid"); li += 1
        x = jnp.transpose(x, (1, 0, 2))            # (B, C, out_dim)
        return x.reshape(-1, self.num_zbins, self.num_spectra,
                         self.num_ells, self.num_kbins)


# ---------------------------------- main ----------------------------------------
if __name__ == "__main__":
    cfg = dict(
        num_kbins=16,
        num_ells=2,
        num_zbins=2,
        num_samples=2,          # -> num_spectra = 3, channels C = 6
        num_cosmo_params=4,
        num_bias_params=3,
        mlp_dims=[32, 32, 32],
        num_mlp_blocks=2,
        num_block_layers=2,
        use_skip_connection=True,
    )

    key = jax.random.PRNGKey(0)
    kp, kx = jax.random.split(key)
    model = MLPPallas(cfg, kp)

    num_spectra = cfg["num_samples"] + math.comb(cfg["num_samples"], 2)
    in_cols = cfg["num_cosmo_params"] + num_spectra * cfg["num_bias_params"]
    batch = 2
    X = jax.random.uniform(kx, (batch, in_cols), dtype=jnp.float32)

    out = jax.block_until_ready(model(X, use_pallas=True))
    ref = jax.block_until_ready(model(X, use_pallas=False))

    assert out.shape == (
        batch, cfg["num_zbins"], num_spectra, cfg["num_ells"], cfg["num_kbins"]
    ), out.shape
    # Precision contract (inference-grade): bf16 MXU operands with f32
    # accumulation vs HIGHEST-precision f32 reference -> loosened tolerance.
    np.testing.assert_allclose(np.asarray(out), np.asarray(ref),
                               rtol=2e-2, atol=2e-2)
    print("KERNEL_OK")
</pallas_src>

<mosaic_0001>
module attributes {stable_mosaic.version = 11 : i64} {
  func.func @_fused_mlp_kernel(%arg0: i32, %arg1: memref<6x8x10xf32, #tpu.memory_space<vmem>>, %arg2: memref<6x10x32xbf16, #tpu.memory_space<vmem>>, %arg3: memref<6x1x32xf32, #tpu.memory_space<vmem>>, %arg4: memref<6x32x32xbf16, #tpu.memory_space<vmem>>, %arg5: memref<6x1x32xf32, #tpu.memory_space<vmem>>, %arg6: memref<6x32x32xbf16, #tpu.memory_space<vmem>>, %arg7: memref<6x1x32xf32, #tpu.memory_space<vmem>>, %arg8: memref<6x32x32xbf16, #tpu.memory_space<vmem>>, %arg9: memref<6x1x32xf32, #tpu.memory_space<vmem>>, %arg10: memref<6x32x32xbf16, #tpu.memory_space<vmem>>, %arg11: memref<6x1x32xf32, #tpu.memory_space<vmem>>, %arg12: memref<6x32x32xbf16, #tpu.memory_space<vmem>>, %arg13: memref<6x1x32xf32, #tpu.memory_space<vmem>>, %arg14: memref<6x8x32xf32, #tpu.memory_space<vmem>>) attributes {dimension_semantics = [#tpu.dimension_semantics<parallel>], iteration_bounds = array<i64: 1>, scalar_prefetch = 0 : i64, scratch_operands = 0 : i64, tpu.core_type = #tpu.core_type<tc>, window_params = [{transform_indices = @transform_0, window_bounds = array<i64: 6, 8, 10>}, {pipeline_mode = #tpu.pipeline_mode<synchronous>, transform_indices = @transform_1, window_bounds = array<i64: 6, 10, 32>}, {pipeline_mode = #tpu.pipeline_mode<synchronous>, transform_indices = @transform_2, window_bounds = array<i64: 6, 1, 32>}, {pipeline_mode = #tpu.pipeline_mode<synchronous>, transform_indices = @transform_3, window_bounds = array<i64: 6, 32, 32>}, {pipeline_mode = #tpu.pipeline_mode<synchronous>, transform_indices = @transform_4, window_bounds = array<i64: 6, 1, 32>}, {pipeline_mode = #tpu.pipeline_mode<synchronous>, transform_indices = @transform_5, window_bounds = array<i64: 6, 32, 32>}, {pipeline_mode = #tpu.pipeline_mode<synchronous>, transform_indices = @transform_6, window_bounds = array<i64: 6, 1, 32>}, {pipeline_mode = #tpu.pipeline_mode<synchronous>, transform_indices = @transform_7, window_bounds = array<i64: 6, 32, 32>}, {pipeline_mode = #tpu.pipeline_mode<synchronous>, transform_indices = @transform_8, window_bounds = array<i64: 6, 1, 32>}, {pipeline_mode = #tpu.pipeline_mode<synchronous>, transform_indices = @transform_9, window_bounds = array<i64: 6, 32, 32>}, {pipeline_mode = #tpu.pipeline_mode<synchronous>, transform_indices = @transform_10, window_bounds = array<i64: 6, 1, 32>}, {pipeline_mode = #tpu.pipeline_mode<synchronous>, transform_indices = @transform_11, window_bounds = array<i64: 6, 32, 32>}, {pipeline_mode = #tpu.pipeline_mode<synchronous>, transform_indices = @transform_12, window_bounds = array<i64: 6, 1, 32>}, {transform_indices = @transform_13, window_bounds = array<i64: 6, 8, 32>}]} {
    %c0 = arith.constant 0 : index
    %c0_0 = arith.constant 0 : index
    %c0_1 = arith.constant 0 : index
    %0 = vector.load %arg1[%c0, %c0_0, %c0_1] : memref<6x8x10xf32, #tpu.memory_space<vmem>>, vector<6x8x10xf32>
    %c0_2 = arith.constant 0 : index
    %c0_3 = arith.constant 0 : index
    %c0_4 = arith.constant 0 : index
    %1 = vector.load %arg2[%c0_2, %c0_3, %c0_4] : memref<6x10x32xbf16, #tpu.memory_space<vmem>>, vector<6x10x32xbf16>
    %c0_5 = arith.constant 0 : index
    %c0_6 = arith.constant 0 : index
    %c0_7 = arith.constant 0 : index
    %2 = vector.load %arg3[%c0_5, %c0_6, %c0_7] : memref<6x1x32xf32, #tpu.memory_space<vmem>>, vector<6x1x32xf32>
    %3 = arith.truncf %0 : vector<6x8x10xf32> to vector<6x8x10xbf16>
    %cst = arith.constant dense<0.000000e+00> : vector<6x8x32xf32>
    %4 = tpu.matmul %3, %1, %cst {dimension_numbers = #tpu.dot_dimension_numbers<[2], [1], [1], [2], [0, 0, 0, 1, 1, 2], [0], [0]>} : vector<6x8x10xbf16>, vector<6x10x32xbf16>, vector<6x8x32xf32> -> vector<6x8x32xf32>
    %5 = vector.broadcast %2 : vector<6x1x32xf32> to vector<6x8x32xf32>
    %6 = arith.addf %4, %5 : vector<6x8x32xf32>
    %cst_8 = arith.constant 0.000000e+00 : f32
    %7 = vector.broadcast %cst_8 : f32 to vector<6x8x32xf32>
    %8 = arith.maximumf %6, %7 : vector<6x8x32xf32>
    %c0_9 = arith.constant 0 : index
    %c0_10 = arith.constant 0 : index
    %c0_11 = arith.constant 0 : index
    %9 = vector.load %arg4[%c0_9, %c0_10, %c0_11] : memref<6x32x32xbf16, #tpu.memory_space<vmem>>, vector<6x32x32xbf16>
    %c0_12 = arith.constant 0 : index
    %c0_13 = arith.constant 0 : index
    %c0_14 = arith.constant 0 : index
    %10 = vector.load %arg5[%c0_12, %c0_13, %c0_14] : memref<6x1x32xf32, #tpu.memory_space<vmem>>, vector<6x1x32xf32>
    %11 = arith.truncf %8 : vector<6x8x32xf32> to vector<6x8x32xbf16>
    %cst_15 = arith.constant dense<0.000000e+00> : vector<6x8x32xf32>
    %12 = tpu.matmul %11, %9, %cst_15 {dimension_numbers = #tpu.dot_dimension_numbers<[2], [1], [1], [2], [0, 0, 0, 1, 1, 2], [0], [0]>} : vector<6x8x32xbf16>, vector<6x32x32xbf16>, vector<6x8x32xf32> -> vector<6x8x32xf32>
    %13 = vector.broadcast %10 : vector<6x1x32xf32> to vector<6x8x32xf32>
    %14 = arith.addf %12, %13 : vector<6x8x32xf32>
    %cst_16 = arith.constant 0.000000e+00 : f32
    %15 = vector.broadcast %cst_16 : f32 to vector<6x8x32xf32>
    %16 = arith.maximumf %14, %15 : vector<6x8x32xf32>
    %c0_17 = arith.constant 0 : index
    %c0_18 = arith.constant 0 : index
    %c0_19 = arith.constant 0 : index
    %17 = vector.load %arg6[%c0_17, %c0_18, %c0_19] : memref<6x32x32xbf16, #tpu.memory_space<vmem>>, vector<6x32x32xbf16>
    %c0_20 = arith.constant 0 : index
    %c0_21 = arith.constant 0 : index
    %c0_22 = arith.constant 0 : index
    %18 = vector.load %arg7[%c0_20, %c0_21, %c0_22] : memref<6x1x32xf32, #tpu.memory_space<vmem>>, vector<6x1x32xf32>
    %19 = arith.truncf %16 : vector<6x8x32xf32> to vector<6x8x32xbf16>
    %cst_23 = arith.constant dense<0.000000e+00> : vector<6x8x32xf32>
    %20 = tpu.matmul %19, %17, %cst_23 {dimension_numbers = #tpu.dot_dimension_numbers<[2], [1], [1], [2], [0, 0, 0, 1, 1, 2], [0], [0]>} : vector<6x8x32xbf16>, vector<6x32x32xbf16>, vector<6x8x32xf32> -> vector<6x8x32xf32>
    %21 = vector.broadcast %18 : vector<6x1x32xf32> to vector<6x8x32xf32>
    %22 = arith.addf %20, %21 : vector<6x8x32xf32>
    %23 = arith.addf %22, %8 : vector<6x8x32xf32>
    %c0_24 = arith.constant 0 : index
    %c0_25 = arith.constant 0 : index
    %c0_26 = arith.constant 0 : index
    %24 = vector.load %arg8[%c0_24, %c0_25, %c0_26] : memref<6x32x32xbf16, #tpu.memory_space<vmem>>, vector<6x32x32xbf16>
    %c0_27 = arith.constant 0 : index
    %c0_28 = arith.constant 0 : index
    %c0_29 = arith.constant 0 : index
    %25 = vector.load %arg9[%c0_27, %c0_28, %c0_29] : memref<6x1x32xf32, #tpu.memory_space<vmem>>, vector<6x1x32xf32>
    %26 = arith.truncf %23 : vector<6x8x32xf32> to vector<6x8x32xbf16>
    %cst_30 = arith.constant dense<0.000000e+00> : vector<6x8x32xf32>
    %27 = tpu.matmul %26, %24, %cst_30 {dimension_numbers = #tpu.dot_dimension_numbers<[2], [1], [1], [2], [0, 0, 0, 1, 1, 2], [0], [0]>} : vector<6x8x32xbf16>, vector<6x32x32xbf16>, vector<6x8x32xf32> -> vector<6x8x32xf32>
    %28 = vector.broadcast %25 : vector<6x1x32xf32> to vector<6x8x32xf32>
    %29 = arith.addf %27, %28 : vector<6x8x32xf32>
    %cst_31 = arith.constant 0.000000e+00 : f32
    %30 = vector.broadcast %cst_31 : f32 to vector<6x8x32xf32>
    %31 = arith.maximumf %29, %30 : vector<6x8x32xf32>
    %c0_32 = arith.constant 0 : index
    %c0_33 = arith.constant 0 : index
    %c0_34 = arith.constant 0 : index
    %32 = vector.load %arg10[%c0_32, %c0_33, %c0_34] : memref<6x32x32xbf16, #tpu.memory_space<vmem>>, vector<6x32x32xbf16>
    %c0_35 = arith.constant 0 : index
    %c0_36 = arith.constant 0 : index
    %c0_37 = arith.constant 0 : index
    %33 = vector.load %arg11[%c0_35, %c0_36, %c0_37] : memref<6x1x32xf32, #tpu.memory_space<vmem>>, vector<6x1x32xf32>
    %34 = arith.truncf %31 : vector<6x8x32xf32> to vector<6x8x32xbf16>
    %cst_38 = arith.constant dense<0.000000e+00> : vector<6x8x32xf32>
    %35 = tpu.matmul %34, %32, %cst_38 {dimension_numbers = #tpu.dot_dimension_numbers<[2], [1], [1], [2], [0, 0, 0, 1, 1, 2], [0], [0]>} : vector<6x8x32xbf16>, vector<6x32x32xbf16>, vector<6x8x32xf32> -> vector<6x8x32xf32>
    %36 = vector.broadcast %33 : vector<6x1x32xf32> to vector<6x8x32xf32>
    %37 = arith.addf %35, %36 : vector<6x8x32xf32>
    %38 = arith.addf %37, %23 : vector<6x8x32xf32>
    %cst_39 = arith.constant 0.000000e+00 : f32
    %39 = vector.broadcast %cst_39 : f32 to vector<6x8x32xf32>
    %40 = arith.maximumf %38, %39 : vector<6x8x32xf32>
    %c0_40 = arith.constant 0 : index
    %c0_41 = arith.constant 0 : index
    %c0_42 = arith.constant 0 : index
    %41 = vector.load %arg12[%c0_40, %c0_41, %c0_42] : memref<6x32x32xbf16, #tpu.memory_space<vmem>>, vector<6x32x32xbf16>
    %c0_43 = arith.constant 0 : index
    %c0_44 = arith.constant 0 : index
    %c0_45 = arith.constant 0 : index
    %42 = vector.load %arg13[%c0_43, %c0_44, %c0_45] : memref<6x1x32xf32, #tpu.memory_space<vmem>>, vector<6x1x32xf32>
    %43 = arith.truncf %40 : vector<6x8x32xf32> to vector<6x8x32xbf16>
    %cst_46 = arith.constant dense<0.000000e+00> : vector<6x8x32xf32>
    %44 = tpu.matmul %43, %41, %cst_46 {dimension_numbers = #tpu.dot_dimension_numbers<[2], [1], [1], [2], [0, 0, 0, 1, 1, 2], [0], [0]>} : vector<6x8x32xbf16>, vector<6x32x32xbf16>, vector<6x8x32xf32> -> vector<6x8x32xf32>
    %45 = vector.broadcast %42 : vector<6x1x32xf32> to vector<6x8x32xf32>
    %46 = arith.addf %44, %45 : vector<6x8x32xf32>
    %cst_47 = arith.constant 5.000000e-01 : f32
    %47 = vector.broadcast %cst_47 : f32 to vector<6x8x32xf32>
    %48 = arith.mulf %47, %46 : vector<6x8x32xf32>
    %49 = math.tanh %48 : vector<6x8x32xf32>
    %cst_48 = arith.constant 5.000000e-01 : f32
    %50 = vector.broadcast %cst_48 : f32 to vector<6x8x32xf32>
    %51 = arith.mulf %50, %49 : vector<6x8x32xf32>
    %cst_49 = arith.constant 5.000000e-01 : f32
    %52 = vector.broadcast %cst_49 : f32 to vector<6x8x32xf32>
    %53 = arith.addf %51, %52 : vector<6x8x32xf32>
    %c0_50 = arith.constant 0 : index
    %c0_51 = arith.constant 0 : index
    %c0_52 = arith.constant 0 : index
    %54 = vector.load %arg14[%c0_50, %c0_51, %c0_52] : memref<6x8x32xf32, #tpu.memory_space<vmem>>, vector<6x8x32xf32>
    tpu.vector_store %arg14[%c0_50, %c0_51, %c0_52], %53 {strides = array<i32>} : memref<6x8x32xf32, #tpu.memory_space<vmem>>, vector<6x8x32xf32>,
    return
  }
  func.func @transform_0(%arg0: i32) -> (i32, i32, i32) {
    %c0_i32 = arith.constant 0 : i32
    %c0_i32_0 = arith.constant 0 : i32
    %c0_i32_1 = arith.constant 0 : i32
    return %c0_i32, %arg0, %c0_i32_0 : i32, i32, i32
  }
  func.func @transform_1(%arg0: i32) -> (i32, i32, i32) {
    %c0_i32 = arith.constant 0 : i32
    %c0_i32_0 = arith.constant 0 : i32
    %c0_i32_1 = arith.constant 0 : i32
    %c0_i32_2 = arith.constant 0 : i32
    return %c0_i32, %c0_i32_0, %c0_i32_1 : i32, i32, i32
  }
  func.func @transform_2(%arg0: i32) -> (i32, i32, i32) {
    %c0_i32 = arith.constant 0 : i32
    %c0_i32_0 = arith.constant 0 : i32
    %c0_i32_1 = arith.constant 0 : i32
    %c0_i32_2 = arith.constant 0 : i32
    return %c0_i32, %c0_i32_0, %c0_i32_1 : i32, i32, i32
  }
  func.func @transform_3(%arg0: i32) -> (i32, i32, i32) {
    %c0_i32 = arith.constant 0 : i32
    %c0_i32_0 = arith.constant 0 : i32
    %c0_i32_1 = arith.constant 0 : i32
    %c0_i32_2 = arith.constant 0 : i32
    return %c0_i32, %c0_i32_0, %c0_i32_1 : i32, i32, i32
  }
  func.func @transform_4(%arg0: i32) -> (i32, i32, i32) {
    %c0_i32 = arith.constant 0 : i32
    %c0_i32_0 = arith.constant 0 : i32
    %c0_i32_1 = arith.constant 0 : i32
    %c0_i32_2 = arith.constant 0 : i32
    return %c0_i32, %c0_i32_0, %c0_i32_1 : i32, i32, i32
  }
  func.func @transform_5(%arg0: i32) -> (i32, i32, i32) {
    %c0_i32 = arith.constant 0 : i32
    %c0_i32_0 = arith.constant 0 : i32
    %c0_i32_1 = arith.constant 0 : i32
    %c0_i32_2 = arith.constant 0 : i32
    return %c0_i32, %c0_i32_0, %c0_i32_1 : i32, i32, i32
  }
  func.func @transform_6(%arg0: i32) -> (i32, i32, i32) {
    %c0_i32 = arith.constant 0 : i32
    %c0_i32_0 = arith.constant 0 : i32
    %c0_i32_1 = arith.constant 0 : i32
    %c0_i32_2 = arith.constant 0 : i32
    return %c0_i32, %c0_i32_0, %c0_i32_1 : i32, i32, i32
  }
  func.func @transform_7(%arg0: i32) -> (i32, i32, i32) {
    %c0_i32 = arith.constant 0 : i32
    %c0_i32_0 = arith.constant 0 : i32
    %c0_i32_1 = arith.constant 0 : i32
    %c0_i32_2 = arith.constant 0 : i32
    return %c0_i32, %c0_i32_0, %c0_i32_1 : i32, i32, i32
  }
  func.func @transform_8(%arg0: i32) -> (i32, i32, i32) {
    %c0_i32 = arith.constant 0 : i32
    %c0_i32_0 = arith.constant 0 : i32
    %c0_i32_1 = arith.constant 0 : i32
    %c0_i32_2 = arith.constant 0 : i32
    return %c0_i32, %c0_i32_0, %c0_i32_1 : i32, i32, i32
  }
  func.func @transform_9(%arg0: i32) -> (i32, i32, i32) {
    %c0_i32 = arith.constant 0 : i32
    %c0_i32_0 = arith.constant 0 : i32
    %c0_i32_1 = arith.constant 0 : i32
    %c0_i32_2 = arith.constant 0 : i32
    return %c0_i32, %c0_i32_0, %c0_i32_1 : i32, i32, i32
  }
  func.func @transform_10(%arg0: i32) -> (i32, i32, i32) {
    %c0_i32 = arith.constant 0 : i32
    %c0_i32_0 = arith.constant 0 : i32
    %c0_i32_1 = arith.constant 0 : i32
    %c0_i32_2 = arith.constant 0 : i32
    return %c0_i32, %c0_i32_0, %c0_i32_1 : i32, i32, i32
  }
  func.func @transform_11(%arg0: i32) -> (i32, i32, i32) {
    %c0_i32 = arith.constant 0 : i32
    %c0_i32_0 = arith.constant 0 : i32
    %c0_i32_1 = arith.constant 0 : i32
    %c0_i32_2 = arith.constant 0 : i32
    return %c0_i32, %c0_i32_0, %c0_i32_1 : i32, i32, i32
  }
  func.func @transform_12(%arg0: i32) -> (i32, i32, i32) {
    %c0_i32 = arith.constant 0 : i32
    %c0_i32_0 = arith.constant 0 : i32
    %c0_i32_1 = arith.constant 0 : i32
    %c0_i32_2 = arith.constant 0 : i32
    return %c0_i32, %c0_i32_0, %c0_i32_1 : i32, i32, i32
  }
  func.func @transform_13(%arg0: i32) -> (i32, i32, i32) {
    %c0_i32 = arith.constant 0 : i32
    %c0_i32_0 = arith.constant 0 : i32
    %c0_i32_1 = arith.constant 0 : i32
    return %c0_i32, %arg0, %c0_i32_0 : i32, i32, i32
  }
}

</mosaic_0001>

<bundles_post_ra>
// kernel: tpu_custom_call.1
= control target key start
LH: loop header
LB: loop body
LE: loop exit
PB: predicated region body
PF: predicated region fallthrough
CT: control target
= control target key end

     0   :  { %18 = vsyncpa [#allocation3], 0  ;;  %s3949_s0 = inlined_call_operand.hbm [shape: f32[6,8,10], index: 0, kind: input, shape index: {}]   ;;  %s3950_s1 = inlined_call_operand.vmem [shape: bf16[6,10,32], index: 1, kind: input, shape index: {}]   ;;  %s3951_s2 = inlined_call_operand.hbm [shape: f32[6,1,32], index: 2, kind: input, shape index: {}]   ;;  %s3952_s3 = inlined_call_operand.vmem [shape: bf16[6,32,32], index: 3, kind: input, shape index: {}]   ;;  %s3953_s4 = inlined_call_operand.vmem [shape: f32[6,1,32], index: 4, kind: input, shape index: {}]   ;;  %s3954_s5 = inlined_call_operand.hbm [shape: bf16[6,32,32], index: 5, kind: input, shape index: {}]   ;;  %s3955_s6 = inlined_call_operand.vmem [shape: f32[6,1,32], index: 6, kind: input, shape index: {}]   ;;  %s3956_s7 = inlined_call_operand.hbm [shape: bf16[6,32,32], index: 7, kind: input, shape index: {}]   ;;  %s3957_s8 = inlined_call_operand.vmem [shape: f32[6,1,32], index: 8, kind: input, shape index: {}]   ;;  %s3958_s9 = inlined_call_operand.hbm [shape: bf16[6,32,32], index: 9, kind: input, shape index: {}]   ;;  %s3959_s10 = inlined_call_operand.vmem [shape: f32[6,1,32], index: 10, kind: input, shape index: {}]   ;;  %s3960_s11 = inlined_call_operand.hbm [shape: bf16[6,32,32], index: 11, kind: input, shape index: {}]   ;;  %s3961_s12 = inlined_call_operand.vmem [shape: f32[6,1,32], index: 12, kind: input, shape index: {}]   ;;  %s3962_s13 = inlined_call_operand.hbm [shape: f32[6,8,32], index: 13, kind: output, shape index: {}]  }
   0x1   :  { %19 = vsyncpa [#allocation6], 0 }
   0x2   :  { %20 = vsyncpa [#allocation9], 0 }
   0x3   :  { %21 = vsyncpa [#allocation12], 0 }
   0x4   :  { %22 = vsyncpa [#allocation4], 0  ;;  %s3372_s25 = smov [#allocation5]   ;;  %s3208_s29 = scalar_lea.hbm %s3951_s2, 96 }
   0x5   :  { %s42_s26 = sshll.u32 %s3372_s25, 4  ;;  %p3209_p0 = scmp.ne.s32.totalorder %s3951_s2, %s3208_s29  ;;  %s43_s26 = int_to_ptr.vmem [resolvable:$true] %s42_s26 }
   0x6   :  { %p3212_p1 = scmp.lt.u32.totalorder %s3208_s29, %s3951_s2 }
   0x8   :  { %p3214_p2 = pnand %p3212_p1, %p3209_p0 }
   0xa   :  { %3217 = shalt.err (!%p3214_p2)
}
   0xb   :  { %s3218_s17 = scalar_lea.vmem %s43_s26, 96  ;;  %p3223_p4 = scmp.lt.s32.totalorder %s43_s26, %s43_s26 }
   0xc   :  { %p3219_p3 = scmp.ne.s32.totalorder %s43_s26, %s3218_s17  ;;  %p3224_p5 = scmp.lt.s32.totalorder %s3218_s17, %s3218_s17 }
   0xe   :  { %p3225_p6 = por %p3224_p5, %p3223_p4 }
  0x10   :  { %p3226_p7 = pnand %p3225_p6, %p3219_p3 }
  0x12   :  { %3229 = shalt.err (!%p3226_p7)
}
  0x13   :  { %s3373_s18 = smov 16   ;;  %s3374_s19 = smov 1  }
  0x14   :  { %48 = dma.hbm_to_vmem [thread:$0]  %s3951_s2, 96, %s43_s26, [#allocation6], %s3373_s18, %s3373_s18, %s3374_s19  }
  0x15   :  { %s3375_s22 = smov [#allocation8]   ;;  %s3376_s24 = smov [#allocation2]  }
  0x16   :  { %s72_s23 = sshll.u32 %s3375_s22, 4  ;;  %s28_s25 = sshll.u32 %s3376_s24, 4  ;;  %s73_s23 = int_to_ptr.vmem [resolvable:$true] %s72_s23  ;;  %s29_s25 = int_to_ptr.vmem [resolvable:$true] %s28_s25 }
  0x17   :  { %s3230_s29 = scalar_lea.hbm %s3956_s7, 1536 }
  0x18   :  { %p3231_p8 = scmp.ne.s32.totalorder %s3956_s7, %s3230_s29  ;;  %p3234_p9 = scmp.lt.u32.totalorder %s3230_s29, %s3956_s7 }
  0x1a   :  { %p3236_p10 = pnand %p3234_p9, %p3231_p8 }
  0x1c   :  { %3239 = shalt.err (!%p3236_p10)
}
  0x1d   :  { %s3240_s2 = scalar_lea.vmem %s73_s23, 1536  ;;  %p3245_p12 = scmp.lt.s32.totalorder %s73_s23, %s73_s23 }
  0x1e   :  { %p3241_p11 = scmp.ne.s32.totalorder %s73_s23, %s3240_s2  ;;  %p3246_p13 = scmp.lt.s32.totalorder %s3240_s2, %s3240_s2 }
  0x20   :  { %p3247_p0 = por %p3246_p13, %p3245_p12 }
  0x22   :  { %p3248_p1 = pnand %p3247_p0, %p3241_p11 }
  0x24   :  { %3251 = shalt.err (!%p3248_p1)
}
  0x25   :  { %s3377_s26 = smov 64   ;;  %s3378_s17 = smov 4  }
  0x26   :  { %78 = dma.hbm_to_vmem [thread:$0]  %s3956_s7, 1536, %s73_s23, [#allocation9], %s3377_s26, %s3377_s26, %s3378_s17  }
  0x27   :  { %s3252_s22 = scalar_lea.hbm %s3949_s0, 768 }
  0x28   :  { %p3253_p2 = scmp.ne.s32.totalorder %s3949_s0, %s3252_s22  ;;  %p3256_p3 = scmp.lt.u32.totalorder %s3252_s22, %s3949_s0 }
  0x2a   :  { %p3258_p4 = pnand %p3256_p3, %p3253_p2 }
  0x2c   :  { %3261 = shalt.err (!%p3258_p4)
}
  0x2d   :  { %s3262_s30 = scalar_lea.vmem %s29_s25, 768  ;;  %p3267_p6 = scmp.lt.s32.totalorder %s29_s25, %s29_s25 }
  0x2e   :  { %p3263_p5 = scmp.ne.s32.totalorder %s29_s25, %s3262_s30  ;;  %p3268_p7 = scmp.lt.s32.totalorder %s3262_s30, %s3262_s30 }
  0x30   :  { %p3269_p8 = por %p3268_p7, %p3267_p6 }
  0x32   :  { %p3270_p9 = pnand %p3269_p8, %p3263_p5 }
  0x34   :  { %3273 = shalt.err (!%p3270_p9)
}
  0x35   :  { %s3379_s7 = smov 128   ;;  %s3380_s23 = smov 8  }
  0x36   :  { %34 = dma.hbm_to_vmem [thread:$0]  %s3949_s0, 768, %s29_s25, [#allocation3], %s3379_s7, %s3379_s7, %s3380_s23  }
  0x37   :  { %s3381_s16 = smov [#allocation7]   ;;  %s3382_s18 = smov [#allocation10]  }
  0x38   :  { %s58_s2 = sshll.u32 %s3381_s16, 4  ;;  %s86_s19 = sshll.u32 %s3382_s18, 4  ;;  %s59_s2 = int_to_ptr.vmem [resolvable:$true] %s58_s2  ;;  %s87_s19 = int_to_ptr.vmem [resolvable:$true] %s86_s19 }
  0x39   :  { %s3274_s22 = scalar_lea.hbm %s3954_s5, 1536 }
  0x3a   :  { %p3275_p10 = scmp.ne.s32.totalorder %s3954_s5, %s3274_s22  ;;  %p3278_p11 = scmp.lt.u32.totalorder %s3274_s22, %s3954_s5 }
  0x3c   :  { %p3280_p12 = pnand %p3278_p11, %p3275_p10 }
  0x3e   :  { %3283 = shalt.err (!%p3280_p12)
}
  0x3f   :  { %s3284_s0 = scalar_lea.vmem %s59_s2, 1536  ;;  %p3289_p0 = scmp.lt.s32.totalorder %s59_s2, %s59_s2 }
  0x40   :  { %p3285_p13 = scmp.ne.s32.totalorder %s59_s2, %s3284_s0  ;;  %p3290_p1 = scmp.lt.s32.totalorder %s3284_s0, %s3284_s0 }
  0x42   :  { %p3291_p2 = por %p3290_p1, %p3289_p0 }
  0x44   :  { %p3292_p3 = pnand %p3291_p2, %p3285_p13 }
  0x46   :  { %3295 = shalt.err (!%p3292_p3)
}
  0x47   :  { %64 = dma.hbm_to_vmem [thread:$0]  %s3954_s5, 1536, %s59_s2, [#allocation6], %s3377_s26, %s3377_s26, %s3378_s17  }
  0x48   :  { %s3296_s16 = scalar_lea.hbm %s3958_s9, 1536 }
  0x49   :  { %p3297_p4 = scmp.ne.s32.totalorder %s3958_s9, %s3296_s16  ;;  %p3300_p5 = scmp.lt.u32.totalorder %s3296_s16, %s3958_s9 }
  0x4b   :  { %p3302_p6 = pnand %p3300_p5, %p3297_p4 }
  0x4d   :  { %3305 = shalt.err (!%p3302_p6)
}
  0x4e   :  { %s3306_s24 = scalar_lea.vmem %s87_s19, 1536  ;;  %p3311_p8 = scmp.lt.s32.totalorder %s87_s19, %s87_s19 }
  0x4f   :  { %p3307_p7 = scmp.ne.s32.totalorder %s87_s19, %s3306_s24  ;;  %p3312_p9 = scmp.lt.s32.totalorder %s3306_s24, %s3306_s24 }
  0x51   :  { %p3313_p10 = por %p3312_p9, %p3311_p8 }
  0x53   :  { %p3314_p11 = pnand %p3313_p10, %p3307_p7 }
  0x55   :  { %3317 = shalt.err (!%p3314_p11)
}
  0x56   :  { %92 = dma.hbm_to_vmem [thread:$0]  %s3958_s9, 1536, %s87_s19, [#allocation9], %s3377_s26, %s3377_s26, %s3378_s17  }
  0x57   :  { %s3383_s27 = smov [#allocation11]   ;;  %s3318_s25 = scalar_lea.hbm %s3960_s11, 1536 }
  0x58   :  { %s100_s28 = sshll.u32 %s3383_s27, 4  ;;  %p3319_p12 = scmp.ne.s32.totalorder %s3960_s11, %s3318_s25  ;;  %s101_s28 = int_to_ptr.vmem [resolvable:$true] %s100_s28 }
  0x59   :  { %p3322_p13 = scmp.lt.u32.totalorder %s3318_s25, %s3960_s11 }
  0x5b   :  { %p3324_p0 = pnand %p3322_p13, %p3319_p12 }
  0x5d   :  { %3327 = shalt.err (!%p3324_p0)
}
  0x5e   :  { %s3328_s18 = scalar_lea.vmem %s101_s28, 1536  ;;  %p3333_p2 = scmp.lt.s32.totalorder %s101_s28, %s101_s28 }
  0x5f   :  { %p3329_p1 = scmp.ne.s32.totalorder %s101_s28, %s3328_s18  ;;  %p3334_p3 = scmp.lt.s32.totalorder %s3328_s18, %s3328_s18 }
  0x61   :  { %p3335_p4 = por %p3334_p3, %p3333_p2 }
  0x63   :  { %p3336_p5 = pnand %p3335_p4, %p3329_p1 }
  0x65   :  { %3339 = shalt.err (!%p3336_p5)
}
  0x66   :  { %106 = dma.hbm_to_vmem [thread:$0]  %s3960_s11, 1536, %s101_s28, [#allocation12], %s3377_s26, %s3377_s26, %s3378_s17  }
  0x67   :  { %3362 = dma.done.wait [#allocation3], 768  }
  0x68   :  { %3363 = vsyncadd [#allocation3], 4294966528 }
  0x69   :  { %3364 = dma.done.wait [#allocation6], 1632  }
  0x6a   :  { %3365 = vsyncadd [#allocation6], 4294965664 }
  0x6b   :  { %3366 = dma.done.wait [#allocation9], 3072  }
  0x6c   :  { %3367 = vsyncadd [#allocation9], 4294964224 }
  0x6d   :  { %3368 = dma.done.wait [#allocation12], 1536  }
  0x6e   :  { %3369 = vsyncadd [#allocation12], 4294965760  ;;  %v3384_v0 = vmov 0.0   ;;  %vm3385_vm0 = vmmov 0   ;;  %vm203_vm1 = vcmask 1044480   ;;  %v128_v4 = vld [vmem:[#allocation2] sm:$0xff] }
  0x6f   :  { %2839 = vmatprep.subr.bf16.mxu0 %v3384_v0  ;;  %2845 = vmatprep.subr.bf16.mxu1 %v3384_v0  ;;  %v3130_v1 = vld [vmem:[%s3950_s1] sm:$0x1f]   ;;  %v3131_v2 = vld [vmem:[%s3950_s1 + $0x8] sm:$0x1f]   ;;  %v152_v7 = vpack.c.bf16 %v128_v4, %v128_v4  ;;  %vm199_vm2 = vcmask 80896   ;;  %v130_v14 = vld [vmem:[#allocation2 + $0x10] sm:$0xff] }
  0x70   :  { %2841 = vmatprep.mubr.msk.bf16.mxu0 %vm3385_vm0, %v3384_v0  ;;  %2847 = vmatprep.mubr.msk.bf16.mxu1 %vm3385_vm0, %v3384_v0  ;;  %v205_v3 = vsel %vm203_vm1, %v3130_v1, 0  ;;  %v129_v5 = vld [vmem:[#allocation2 + $0x8] sm:$0xff]  ;;  %v256_v6 = vsel %vm203_vm1, %v3131_v2, 0  ;;  %v3132_v9 = vld [vmem:[%s3950_s1 + $0x10] sm:$0x1f]   ;;  %v131_v16 = vld [vmem:[#allocation2 + $0x18] sm:$0xff]  ;;  %v154_v19 = vpack.c.bf16 %v130_v14, %v130_v14 }
  0x71   :  { %2840 = vmatpush3.bf16.msra.mxu0 %v205_v3  ;;  %v153_v8 = vpack.c.bf16 %v129_v5, %v129_v5  ;;  %2846 = vmatpush3.bf16.msra.mxu1 %v256_v6  ;;  %v3133_v10 = vld [vmem:[%s3950_s1 + $0x18] sm:$0x1f]   ;;  %v307_v11 = vsel %vm203_vm1, %v3132_v9, 0  ;;  %v3134_v13 = vld [vmem:[%s3950_s1 + $0x20] sm:$0x1f]   ;;  %v155_v20 = vpack.c.bf16 %v131_v16, %v131_v16  ;;  %v133_v22 = vld [vmem:[#allocation2 + $0x28] sm:$0xff] }
  0x72   :  { %2851 = vmatprep.subr.bf16.mxu0 %v3384_v0  ;;  %2857 = vmatprep.subr.bf16.mxu1 %v3384_v0  ;;  %v358_v12 = vsel %vm203_vm1, %v3133_v10, 0  ;;  %v3135_v15 = vld [vmem:[%s3950_s1 + $0x28] sm:$0x1f]   ;;  %v409_v17 = vsel %vm203_vm1, %v3134_v13, 0  ;;  %v132_v21 = vld [vmem:[#allocation2 + $0x20] sm:$0xff]  ;;  %v157_v24 = vpack.c.bf16 %v133_v22, %v133_v22  ;;  %v3137_v26 = vld [vmem:[%s3952_s3 + $0x10] sm:$0xff]  }
  0x73   :  { %v460_v18 = vsel %vm203_vm1, %v3135_v15, 0  ;;  %v156_v23 = vpack.c.bf16 %v132_v21, %v132_v21  ;;  %v3136_v25 = vld [vmem:[%s3952_s3] sm:$0xff]   ;;  %v3138_v27 = vld [vmem:[%s3952_s3 + $0x8] sm:$0xff]   ;;  %v3139_v28 = vld [vmem:[%s3952_s3 + $0x18] sm:$0xff]   ;;  %vm592_vm3 = vcmask 261120  }
  0x74   :  { %2842 = vmatmul.mubr.msk.bf16.vlgmr.msra.gmra.mrb[0].mxu0 %vm199_vm2, %v152_v7  ;;  %2848 = vmatmul.mubr.msk.bf16.vlgmr.msra.gmra.mrb[0].mxu1 %vm199_vm2, %v153_v8  ;;  %v2599_v29 = vld [vmem:[#allocation5] ss:$0 sm:$0xff]  ;;  %v2600_v30 = vld [vmem:[#allocation5 + $0x1] ss:$0 sm:$0xff]  ;;  %v3140_v43 = vld [vmem:[%s3952_s3 + $0x20] sm:$0xff]  }
  0x75   :  { %2852 = vmatpush3.bf16.msra.mxu0 %v307_v11  ;;  %2858 = vmatpush3.bf16.msra.mxu1 %v358_v12  ;;  %v3141_v45 = vld [vmem:[%s3952_s3 + $0x30] sm:$0xff]   ;;  %v3142_v50 = vld [vmem:[%s3952_s3 + $0x28] sm:$0xff]   ;;  %v3143_v54 = vld [vmem:[%s3952_s3 + $0x38] sm:$0xff]  }
  0x76   :  { %2853 = vmatprep.mubr.msk.bf16.mxu0 %vm3385_vm0, %v3384_v0  ;;  %2859 = vmatprep.mubr.msk.bf16.mxu1 %vm3385_vm0, %v3384_v0  ;;  %v2601_v47 = vld [vmem:[#allocation5 + $0x2] ss:$0 sm:$0xff]  ;;  %v2602_v48 = vld [vmem:[#allocation5 + $0x3] ss:$0 sm:$0xff]  ;;  %v3144_v63 = vld [vmem:[%s3952_s3 + $0x40] sm:$0xff]  }
  0x77   :  { %2863 = vmatprep.subr.bf16.mxu0 %v3384_v0  ;;  %2869 = vmatprep.subr.bf16.mxu1 %v3384_v0  ;;  %v3145_v2 = vld [vmem:[%s3952_s3 + $0x50] sm:$0xff]   ;;  %v3146_v7 = vld [vmem:[%s3952_s3 + $0x48] sm:$0xff]   ;;  %v3147_v11 = vld [vmem:[%s3952_s3 + $0x58] sm:$0xff]  }
  0x78   :  { %v2603_v4 = vld [vmem:[#allocation5 + $0x4] ss:$0 sm:$0xff]  ;;  %v2604_v5 = vld [vmem:[#allocation5 + $0x5] ss:$0 sm:$0xff]  ;;  %v3148_v22 = vld [vmem:[#allocation7] sm:$0xff]  }
  0x7c   :  { %2854 = vmatmul.mubr.msk.bf16.vlgmr.msra.gmra.mrb[4].mxu0 %vm199_vm2, %v154_v19  ;;  %2860 = vmatmul.mubr.msk.bf16.vlgmr.msra.gmra.mrb[4].mxu1 %vm199_vm2, %v155_v20 }
  0x7d   :  { %2864 = vmatpush3.bf16.msra.mxu0 %v409_v17  ;;  %2870 = vmatpush3.bf16.msra.mxu1 %v460_v18 }
  0x7e   :  { %2865 = vmatprep.mubr.msk.bf16.mxu0 %vm3385_vm0, %v3384_v0  ;;  %2871 = vmatprep.mubr.msk.bf16.mxu1 %vm3385_vm0, %v3384_v0 }
  0x7f   :  { %2875 = vmatprep.subr.bf16.mxu0 %v3384_v0  ;;  %2883 = vmatprep.subr.bf16.mxu1 %v3384_v0 }
  0x84   :  { %2866 = vmatmul.mubr.msk.bf16.vlgmr.msra.gmra.mrb[8].mxu0 %vm199_vm2, %v156_v23  ;;  %2872 = vmatmul.mubr.msk.bf16.vlgmr.msra.gmra.mrb[8].mxu1 %vm199_vm2, %v157_v24  ;;  %v3149_v23 = vld [vmem:[#allocation7 + $0x10] sm:$0xff]   ;;  %v3150_v24 = vld [vmem:[#allocation7 + $0x8] sm:$0xff]  }
  0x85   :  { %2879 = vmatprep.mubr.msk.bf16.mxu0 %vm3385_vm0, %v3384_v0  ;;  %2887 = vmatprep.mubr.msk.bf16.mxu1 %vm3385_vm0, %v3384_v0 }
  0x86   :  { %2876 = vmatpush3.bf16.msra.mxu0 %v3136_v25  ;;  %2884 = vmatpush3.bf16.msra.mxu1 %v3137_v26  ;;  %v3151_v25 = vld [vmem:[#allocation7 + $0x18] sm:$0xff]   ;;  %v2617_v26 = vld [vmem:[%s3953_s4] ss:$0 sm:$0xff] }
  0x87   :  { %2877 = vmatprep.subr.bf16.mxu0 %v3384_v0  ;;  %2885 = vmatprep.subr.bf16.mxu1 %v3384_v0 }
  0x8a   :  { %2878 = vmatpush3.bf16.msra.mxu0 %v3138_v27  ;;  %2886 = vmatpush3.bf16.msra.mxu1 %v3139_v28  ;;  %v2618_v27 = vld [vmem:[%s3953_s4 + $0x1] ss:$0 sm:$0xff] }
  0x8b   :  { %2891 = vmatprep.subr.bf16.mxu0 %v3384_v0  ;;  %2899 = vmatprep.subr.bf16.mxu1 %v3384_v0 }
 0x147   :  { %v241_v31 = vpop.f32.mrb[0].mxu0  ;;  %v292_v33 = vpop.f32.mrb[0].mxu1 }
 0x148   :  { %v242_v32 = vadd.f32 %v2599_v29, %v241_v31  ;;  %v2843_v34 = vpop.f32.mrb[1].mxu0  ;;  %v293_v35 = vadd.f32 %v2600_v30, %v292_v33  ;;  %v2849_v36 = vpop.f32.mrb[1].mxu1 }
 0x149   :  { %v244_v37 = vpop.f32.mrb[2].mxu0  ;;  %v295_v39 = vpop.f32.mrb[2].mxu1 }
 0x14a   :  { %v3614_v38 = vmax.f32 %v242_v32, 0.0  ;;  %v2844_v40 = vpop.f32.mrb[3].mxu0  ;;  %v3616_v41 = vmax.f32 %v293_v35, 0.0  ;;  %v2850_v42 = vpop.f32.mrb[3].mxu1 }
 0x14b   :  { %v3152_v42 = vld [vmem:[#allocation7 + $0x20] sm:$0xff]  }
 0x14c   :  { %v538_v44 = vpack.c.bf16 %v3614_v38, %v3614_v38  ;;  %v539_v46 = vpack.c.bf16 %v3616_v41, %v3616_v41 }
 0x14e   :  { %2880 = vmatmul.mubr.msk.bf16.vlgmr.msra.gmra.mrb[12].mxu0 %vm592_vm3, %v538_v44  ;;  %2888 = vmatmul.mubr.msk.bf16.vlgmr.msra.gmra.mrb[12].mxu1 %vm592_vm3, %v539_v46  ;;  %v3153_v44 = vld [vmem:[#allocation7 + $0x30] sm:$0xff]   ;;  %v2619_v46 = vld [vmem:[%s3953_s4 + $0x2] ss:$0 sm:$0xff] }
 0x14f   :  { %v343_v49 = vpop.f32.mrb[4].mxu0  ;;  %2892 = vmatpush3.bf16.msra.mxu0 %v3140_v43  ;;  %v394_v52 = vpop.f32.mrb[4].mxu1  ;;  %2900 = vmatpush3.bf16.msra.mxu1 %v3141_v45 }
 0x150   :  { %v344_v51 = vadd.f32 %v2601_v47, %v343_v49  ;;  %v2855_v53 = vpop.f32.mrb[5].mxu0  ;;  %2893 = vmatprep.subr.bf16.mxu0 %v3384_v0  ;;  %v395_v55 = vadd.f32 %v2602_v48, %v394_v52  ;;  %v2861_v56 = vpop.f32.mrb[5].mxu1  ;;  %2901 = vmatprep.subr.bf16.mxu1 %v3384_v0  ;;  %v2620_v47 = vld [vmem:[%s3953_s4 + $0x3] ss:$0 sm:$0xff] }
 0x151   :  { %v346_v57 = vpop.f32.mrb[6].mxu0  ;;  %2895 = vmatprep.mubr.msk.bf16.mxu0 %vm3385_vm0, %v3384_v0  ;;  %v397_v59 = vpop.f32.mrb[6].mxu1  ;;  %2903 = vmatprep.mubr.msk.bf16.mxu1 %vm3385_vm0, %v3384_v0  ;;  %v3154_v49 = vld [vmem:[#allocation7 + $0x28] sm:$0xff]   ;;  %v3155_v53 = vld [vmem:[#allocation7 + $0x38] sm:$0xff]  }
 0x152   :  { %v3640_v58 = vmax.f32 %v344_v51, 0.0  ;;  %v2856_v60 = vpop.f32.mrb[7].mxu0  ;;  %v3644_v61 = vmax.f32 %v395_v55, 0.0  ;;  %v2862_v62 = vpop.f32.mrb[7].mxu1 }
 0x153   :  { %2894 = vmatpush3.bf16.msra.mxu0 %v3142_v50  ;;  %2902 = vmatpush3.bf16.msra.mxu1 %v3143_v54 }
 0x154   :  { %v540_v1 = vpack.c.bf16 %v3640_v58, %v3640_v58  ;;  %2907 = vmatprep.subr.bf16.mxu0 %v3384_v0  ;;  %v541_v3 = vpack.c.bf16 %v3644_v61, %v3644_v61  ;;  %2915 = vmatprep.subr.bf16.mxu1 %v3384_v0 }
 0x156   :  { %2896 = vmatmul.mubr.msk.bf16.vlgmr.msra.gmra.mrb[16].mxu0 %vm592_vm3, %v540_v1  ;;  %2904 = vmatmul.mubr.msk.bf16.vlgmr.msra.gmra.mrb[16].mxu1 %vm592_vm3, %v541_v3  ;;  %v3156_v1 = vld [vmem:[#allocation7 + $0x40] sm:$0xff]   ;;  %v3157_v3 = vld [vmem:[#allocation7 + $0x50] sm:$0xff]  }
 0x157   :  { %v445_v6 = vpop.f32.mrb[8].mxu0  ;;  %2908 = vmatpush3.bf16.msra.mxu0 %v3144_v63  ;;  %v496_v9 = vpop.f32.mrb[8].mxu1  ;;  %2916 = vmatpush3.bf16.msra.mxu1 %v3145_v2 }
 0x158   :  { %v446_v8 = vadd.f32 %v2603_v4, %v445_v6  ;;  %v2867_v10 = vpop.f32.mrb[9].mxu0  ;;  %2909 = vmatprep.subr.bf16.mxu0 %v3384_v0  ;;  %v497_v12 = vadd.f32 %v2604_v5, %v496_v9  ;;  %v2873_v13 = vpop.f32.mrb[9].mxu1  ;;  %2917 = vmatprep.subr.bf16.mxu1 %v3384_v0  ;;  %v2621_v5 = vld [vmem:[%s3953_s4 + $0x4] ss:$0 sm:$0xff]  ;;  %v2622_v6 = vld [vmem:[%s3953_s4 + $0x5] ss:$0 sm:$0xff] }
 0x159   :  { %v448_v14 = vpop.f32.mrb[10].mxu0  ;;  %2911 = vmatprep.mubr.msk.bf16.mxu0 %vm3385_vm0, %v3384_v0  ;;  %v499_v16 = vpop.f32.mrb[10].mxu1  ;;  %2919 = vmatprep.mubr.msk.bf16.mxu1 %vm3385_vm0, %v3384_v0 }
 0x15a   :  { %v3670_v15 = vmax.f32 %v446_v8, 0.0  ;;  %v2868_v17 = vpop.f32.mrb[11].mxu0  ;;  %v3674_v18 = vmax.f32 %v497_v12, 0.0  ;;  %v2874_v19 = vpop.f32.mrb[11].mxu1  ;;  %v3158_v8 = vld [vmem:[#allocation7 + $0x48] sm:$0xff]   ;;  %v3159_v12 = vld [vmem:[#allocation7 + $0x58] sm:$0xff]  }
 0x15b   :  { %2910 = vmatpush3.bf16.msra.mxu0 %v3146_v7  ;;  %2918 = vmatpush3.bf16.msra.mxu1 %v3147_v11 }
 0x15c   :  { %v542_v20 = vpack.c.bf16 %v3670_v15, %v3670_v15  ;;  %2923 = vmatprep.subr.bf16.mxu0 %v3384_v0  ;;  %v543_v21 = vpack.c.bf16 %v3674_v18, %v3674_v18  ;;  %2931 = vmatprep.subr.bf16.mxu1 %v3384_v0 }
 0x15e   :  { %2912 = vmatmul.mubr.msk.bf16.vlgmr.msra.gmra.mrb[20].mxu0 %vm592_vm3, %v542_v20  ;;  %2920 = vmatmul.mubr.msk.bf16.vlgmr.msra.gmra.mrb[20].mxu1 %vm592_vm3, %v543_v21 }
 0x15f   :  { %2927 = vmatprep.mubr.msk.bf16.mxu0 %vm3385_vm0, %v3384_v0  ;;  %2935 = vmatprep.mubr.msk.bf16.mxu1 %vm3385_vm0, %v3384_v0 }
 0x160   :  { %2924 = vmatpush3.bf16.msra.mxu0 %v3148_v22  ;;  %2932 = vmatpush3.bf16.msra.mxu1 %v3149_v23 }
 0x161   :  { %2925 = vmatprep.subr.bf16.mxu0 %v3384_v0  ;;  %2933 = vmatprep.subr.bf16.mxu1 %v3384_v0 }
 0x164   :  { %2926 = vmatpush3.bf16.msra.mxu0 %v3150_v24  ;;  %2934 = vmatpush3.bf16.msra.mxu1 %v3151_v25  ;;  %v3160_v25 = vld [vmem:[#allocation8] sm:$0xff]  }
 0x165   :  { %2939 = vmatprep.subr.bf16.mxu0 %v3384_v0  ;;  %2947 = vmatprep.subr.bf16.mxu1 %v3384_v0 }
 0x221   :  { %v630_v28 = vpop.f32.mrb[12].mxu0  ;;  %v685_v30 = vpop.f32.mrb[12].mxu1 }
 0x222   :  { %v631_v29 = vadd.f32 %v2617_v26, %v630_v28  ;;  %v2881_v31 = vpop.f32.mrb[13].mxu0  ;;  %v686_v32 = vadd.f32 %v2618_v27, %v685_v30  ;;  %v2889_v33 = vpop.f32.mrb[13].mxu1  ;;  %v3161_v26 = vld [vmem:[#allocation8 + $0x10] sm:$0xff]   ;;  %v3162_v27 = vld [vmem:[#allocation8 + $0x8] sm:$0xff]   ;;  %v3163_v28 = vld [vmem:[#allocation8 + $0x18] sm:$0xff]  }
 0x223   :  { %v633_v34 = vpop.f32.mrb[14].mxu0  ;;  %v688_v36 = vpop.f32.mrb[14].mxu1  ;;  %v2642_v30 = vld [vmem:[%s3955_s6 + $0x1] ss:$0 sm:$0xff] }
 0x224   :  { %v911_v35 = vmax.f32 %v631_v29, 0.0  ;;  %v2882_v37 = vpop.f32.mrb[15].mxu0  ;;  %v912_v39 = vmax.f32 %v686_v32, 0.0  ;;  %v2890_v40 = vpop.f32.mrb[15].mxu1  ;;  %v2641_v29 = vld [vmem:[%s3955_s6] ss:$0 sm:$0xff] }
 0x226   :  { %v947_v43 = vpack.c.bf16 %v911_v35, %v911_v35  ;;  %v948_v45 = vpack.c.bf16 %v912_v39, %v912_v39 }
 0x228   :  { %2928 = vmatmul.mubr.msk.bf16.vlgmr.msra.gmra.mrb[24].mxu0 %vm592_vm3, %v947_v43  ;;  %2936 = vmatmul.mubr.msk.bf16.vlgmr.msra.gmra.mrb[24].mxu1 %vm592_vm3, %v948_v45  ;;  %v3164_v45 = vld [vmem:[#allocation8 + $0x20] sm:$0xff]  }
 0x229   :  { %v740_v48 = vpop.f32.mrb[16].mxu0  ;;  %2940 = vmatpush3.bf16.msra.mxu0 %v3152_v42  ;;  %v795_v51 = vpop.f32.mrb[16].mxu1  ;;  %2948 = vmatpush3.bf16.msra.mxu1 %v3153_v44 }
 0x22a   :  { %v741_v50 = vadd.f32 %v2619_v46, %v740_v48  ;;  %v2897_v52 = vpop.f32.mrb[17].mxu0  ;;  %2941 = vmatprep.subr.bf16.mxu0 %v3384_v0  ;;  %v796_v54 = vadd.f32 %v2620_v47, %v795_v51  ;;  %v2905_v55 = vpop.f32.mrb[17].mxu1  ;;  %2949 = vmatprep.subr.bf16.mxu1 %v3384_v0  ;;  %v3165_v47 = vld [vmem:[#allocation8 + $0x30] sm:$0xff]  }
 0x22b   :  { %v743_v56 = vpop.f32.mrb[18].mxu0  ;;  %2943 = vmatprep.mubr.msk.bf16.mxu0 %vm3385_vm0, %v3384_v0  ;;  %v798_v59 = vpop.f32.mrb[18].mxu1  ;;  %2951 = vmatprep.mubr.msk.bf16.mxu1 %vm3385_vm0, %v3384_v0 }
 0x22c   :  { %v913_v57 = vmax.f32 %v741_v50, 0.0  ;;  %v2898_v60 = vpop.f32.mrb[19].mxu0  ;;  %v914_v62 = vmax.f32 %v796_v54, 0.0  ;;  %v2906_v63 = vpop.f32.mrb[19].mxu1  ;;  %v3166_v50 = vld [vmem:[#allocation8 + $0x28] sm:$0xff]   ;;  %v3167_v54 = vld [vmem:[#allocation8 + $0x38] sm:$0xff]  }
 0x22d   :  { %2942 = vmatpush3.bf16.msra.mxu0 %v3154_v49  ;;  %2950 = vmatpush3.bf16.msra.mxu1 %v3155_v53  ;;  %v2643_v49 = vld [vmem:[%s3955_s6 + $0x2] ss:$0 sm:$0xff] }
 0x22e   :  { %v949_v2 = vpack.c.bf16 %v913_v57, %v913_v57  ;;  %2955 = vmatprep.subr.bf16.mxu0 %v3384_v0  ;;  %v950_v4 = vpack.c.bf16 %v914_v62, %v914_v62  ;;  %2963 = vmatprep.subr.bf16.mxu1 %v3384_v0 }
 0x230   :  { %2944 = vmatmul.mubr.msk.bf16.vlgmr.msra.gmra.mrb[28].mxu0 %vm592_vm3, %v949_v2  ;;  %2952 = vmatmul.mubr.msk.bf16.vlgmr.msra.gmra.mrb[28].mxu1 %vm592_vm3, %v950_v4  ;;  %v3168_v2 = vld [vmem:[#allocation8 + $0x40] sm:$0xff]   ;;  %v3169_v4 = vld [vmem:[#allocation8 + $0x50] sm:$0xff]  }
 0x231   :  { %v850_v7 = vpop.f32.mrb[20].mxu0  ;;  %2956 = vmatpush3.bf16.msra.mxu0 %v3156_v1  ;;  %v905_v10 = vpop.f32.mrb[20].mxu1  ;;  %2964 = vmatpush3.bf16.msra.mxu1 %v3157_v3 }
 0x232   :  { %v851_v9 = vadd.f32 %v2621_v5, %v850_v7  ;;  %v2913_v11 = vpop.f32.mrb[21].mxu0  ;;  %2957 = vmatprep.subr.bf16.mxu0 %v3384_v0  ;;  %v906_v13 = vadd.f32 %v2622_v6, %v905_v10  ;;  %v2921_v14 = vpop.f32.mrb[21].mxu1  ;;  %2965 = vmatprep.subr.bf16.mxu1 %v3384_v0  ;;  %v2646_v5 = vld [vmem:[%s3955_s6 + $0x5] ss:$0 sm:$0xff] }
 0x233   :  { %v853_v16 = vpop.f32.mrb[22].mxu0  ;;  %2959 = vmatprep.mubr.msk.bf16.mxu0 %vm3385_vm0, %v3384_v0  ;;  %v908_v19 = vpop.f32.mrb[22].mxu1  ;;  %2967 = vmatprep.mubr.msk.bf16.mxu1 %vm3385_vm0, %v3384_v0  ;;  %v3170_v7 = vld [vmem:[#allocation8 + $0x48] sm:$0xff]   ;;  %v3171_v11 = vld [vmem:[#allocation8 + $0x58] sm:$0xff]  }
 0x234   :  { %v915_v17 = vmax.f32 %v851_v9, 0.0  ;;  %v2914_v20 = vpop.f32.mrb[23].mxu0  ;;  %v916_v21 = vmax.f32 %v906_v13, 0.0  ;;  %v2922_v22 = vpop.f32.mrb[23].mxu1 }
 0x235   :  { %2958 = vmatpush3.bf16.msra.mxu0 %v3158_v8  ;;  %2966 = vmatpush3.bf16.msra.mxu1 %v3159_v12 }
 0x236   :  { %v951_v23 = vpack.c.bf16 %v915_v17, %v915_v17  ;;  %2971 = vmatprep.subr.bf16.mxu0 %v3384_v0  ;;  %v952_v24 = vpack.c.bf16 %v916_v21, %v916_v21  ;;  %2979 = vmatprep.subr.bf16.mxu1 %v3384_v0 }
 0x238   :  { %2960 = vmatmul.mubr.msk.bf16.vlgmr.msra.gmra.mrb[32].mxu0 %vm592_vm3, %v951_v23  ;;  %2968 = vmatmul.mubr.msk.bf16.vlgmr.msra.gmra.mrb[32].mxu1 %vm592_vm3, %v952_v24  ;;  %v3173_v23 = vld [vmem:[#allocation10 + $0x10] sm:$0xff]   ;;  %v3174_v24 = vld [vmem:[#allocation10 + $0x8] sm:$0xff]  }
 0x239   :  { %2975 = vmatprep.mubr.msk.bf16.mxu0 %vm3385_vm0, %v3384_v0  ;;  %2983 = vmatprep.mubr.msk.bf16.mxu1 %vm3385_vm0, %v3384_v0 }
 0x23a   :  { %2972 = vmatpush3.bf16.msra.mxu0 %v3160_v25  ;;  %2980 = vmatpush3.bf16.msra.mxu1 %v3161_v26  ;;  %v3175_v25 = vld [vmem:[#allocation10 + $0x18] sm:$0xff]   ;;  %v2665_v26 = vld [vmem:[%s3957_s8] ss:$0 sm:$0xff] }
 0x23b   :  { %2973 = vmatprep.subr.bf16.mxu0 %v3384_v0  ;;  %2981 = vmatprep.subr.bf16.mxu1 %v3384_v0 }
 0x23e   :  { %2974 = vmatpush3.bf16.msra.mxu0 %v3162_v27  ;;  %2982 = vmatpush3.bf16.msra.mxu1 %v3163_v28  ;;  %v2666_v27 = vld [vmem:[%s3957_s8 + $0x1] ss:$0 sm:$0xff] }
 0x23f   :  { %2987 = vmatprep.subr.bf16.mxu0 %v3384_v0  ;;  %2995 = vmatprep.subr.bf16.mxu1 %v3384_v0 }
 0x2fb   :  { %v1038_v31 = vpop.f32.mrb[24].mxu0  ;;  %v1093_v33 = vpop.f32.mrb[24].mxu1 }
 0x2fc   :  { %v1039_v32 = vadd.f32 %v2641_v29, %v1038_v31  ;;  %v2929_v34 = vpop.f32.mrb[25].mxu0  ;;  %v1094_v35 = vadd.f32 %v2642_v30, %v1093_v33  ;;  %v2937_v36 = vpop.f32.mrb[25].mxu1 }
 0x2fd   :  { %v1041_v37 = vpop.f32.mrb[26].mxu0  ;;  %v1096_v40 = vpop.f32.mrb[26].mxu1 }
 0x2fe   :  { %v3747_v39 = vadd.f32 %v1039_v32, %v3614_v38  ;;  %v2930_v42 = vpop.f32.mrb[27].mxu0  ;;  %v3750_v43 = vadd.f32 %v1094_v35, %v3616_v41  ;;  %v2938_v44 = vpop.f32.mrb[27].mxu1  ;;  %v2644_v38 = vld [vmem:[%s3955_s6 + $0x3] ss:$0 sm:$0xff] }
 0x2ff   :  { %v3176_v44 = vld [vmem:[#allocation10 + $0x20] sm:$0xff]  }
 0x300   :  { %v1355_v46 = vpack.c.bf16 %v3747_v39, %v3747_v39  ;;  %v1356_v48 = vpack.c.bf16 %v3750_v43, %v3750_v43 }
 0x302   :  { %2976 = vmatmul.mubr.msk.bf16.vlgmr.msra.gmra.mrb[36].mxu0 %vm592_vm3, %v1355_v46  ;;  %2984 = vmatmul.mubr.msk.bf16.vlgmr.msra.gmra.mrb[36].mxu1 %vm592_vm3, %v1356_v48  ;;  %v3177_v46 = vld [vmem:[#allocation10 + $0x30] sm:$0xff]   ;;  %v2667_v48 = vld [vmem:[%s3957_s8 + $0x2] ss:$0 sm:$0xff] }
 0x303   :  { %v1148_v41 = vpop.f32.mrb[28].mxu0  ;;  %2988 = vmatpush3.bf16.msra.mxu0 %v3164_v45  ;;  %v1203_v52 = vpop.f32.mrb[28].mxu1  ;;  %2996 = vmatpush3.bf16.msra.mxu1 %v3165_v47 }
 0x304   :  { %v1149_v51 = vadd.f32 %v2643_v49, %v1148_v41  ;;  %v2945_v53 = vpop.f32.mrb[29].mxu0  ;;  %2989 = vmatprep.subr.bf16.mxu0 %v3384_v0  ;;  %v1204_v55 = vadd.f32 %v2644_v38, %v1203_v52  ;;  %v2953_v56 = vpop.f32.mrb[29].mxu1  ;;  %2997 = vmatprep.subr.bf16.mxu1 %v3384_v0  ;;  %v2668_v49 = vld [vmem:[%s3957_s8 + $0x3] ss:$0 sm:$0xff] }
 0x305   :  { %v1151_v57 = vpop.f32.mrb[30].mxu0  ;;  %2991 = vmatprep.mubr.msk.bf16.mxu0 %vm3385_vm0, %v3384_v0  ;;  %v1206_v60 = vpop.f32.mrb[30].mxu1  ;;  %2999 = vmatprep.mubr.msk.bf16.mxu1 %vm3385_vm0, %v3384_v0  ;;  %v3178_v41 = vld [vmem:[#allocation10 + $0x28] sm:$0xff]   ;;  %v3179_v53 = vld [vmem:[#allocation10 + $0x38] sm:$0xff]  }
 0x306   :  { %v3769_v59 = vadd.f32 %v1149_v51, %v3640_v58  ;;  %v2946_v62 = vpop.f32.mrb[31].mxu0  ;;  %v3774_v63 = vadd.f32 %v1204_v55, %v3644_v61  ;;  %v2954_v1 = vpop.f32.mrb[31].mxu1  ;;  %v2645_v61 = vld [vmem:[%s3955_s6 + $0x4] ss:$0 sm:$0xff] }
 0x307   :  { %2990 = vmatpush3.bf16.msra.mxu0 %v3166_v50  ;;  %2998 = vmatpush3.bf16.msra.mxu1 %v3167_v54 }
 0x308   :  { %v1357_v3 = vpack.c.bf16 %v3769_v59, %v3769_v59  ;;  %3003 = vmatprep.subr.bf16.mxu0 %v3384_v0  ;;  %v1358_v58 = vpack.c.bf16 %v3774_v63, %v3774_v63  ;;  %3011 = vmatprep.subr.bf16.mxu1 %v3384_v0 }
 0x30a   :  { %2992 = vmatmul.mubr.msk.bf16.vlgmr.msra.gmra.mrb[40].mxu0 %vm592_vm3, %v1357_v3  ;;  %3000 = vmatmul.mubr.msk.bf16.vlgmr.msra.gmra.mrb[40].mxu1 %vm592_vm3, %v1358_v58  ;;  %v3180_v3 = vld [vmem:[#allocation10 + $0x40] sm:$0xff]   ;;  %v3181_v58 = vld [vmem:[#allocation10 + $0x50] sm:$0xff]  }
 0x30b   :  { %v1258_v6 = vpop.f32.mrb[32].mxu0  ;;  %3004 = vmatpush3.bf16.msra.mxu0 %v3168_v2  ;;  %v1313_v9 = vpop.f32.mrb[32].mxu1  ;;  %3012 = vmatpush3.bf16.msra.mxu1 %v3169_v4 }
 0x30c   :  { %v1259_v8 = vadd.f32 %v2645_v61, %v1258_v6  ;;  %v2961_v10 = vpop.f32.mrb[33].mxu0  ;;  %3005 = vmatprep.subr.bf16.mxu0 %v3384_v0  ;;  %v1314_v12 = vadd.f32 %v2646_v5, %v1313_v9  ;;  %v2969_v13 = vpop.f32.mrb[33].mxu1  ;;  %3013 = vmatprep.subr.bf16.mxu1 %v3384_v0  ;;  %v2669_v5 = vld [vmem:[%s3957_s8 + $0x4] ss:$0 sm:$0xff]  ;;  %v2670_v6 = vld [vmem:[%s3957_s8 + $0x5] ss:$0 sm:$0xff] }
 0x30d   :  { %v1261_v14 = vpop.f32.mrb[34].mxu0  ;;  %3007 = vmatprep.mubr.msk.bf16.mxu0 %vm3385_vm0, %v3384_v0  ;;  %v1316_v17 = vpop.f32.mrb[34].mxu1  ;;  %3015 = vmatprep.mubr.msk.bf16.mxu1 %vm3385_vm0, %v3384_v0 }
 0x30e   :  { %v3795_v16 = vadd.f32 %v1259_v8, %v3670_v15  ;;  %v2962_v19 = vpop.f32.mrb[35].mxu0  ;;  %v3800_v20 = vadd.f32 %v1314_v12, %v3674_v18  ;;  %v2970_v21 = vpop.f32.mrb[35].mxu1  ;;  %v3172_v18 = vld [vmem:[#allocation10] sm:$0xff]   ;;  %v3182_v8 = vld [vmem:[#allocation10 + $0x48] sm:$0xff]   ;;  %v3183_v12 = vld [vmem:[#allocation10 + $0x58] sm:$0xff]  }
 0x30f   :  { %3006 = vmatpush3.bf16.msra.mxu0 %v3170_v7  ;;  %3014 = vmatpush3.bf16.msra.mxu1 %v3171_v11 }
 0x310   :  { %v1359_v22 = vpack.c.bf16 %v3795_v16, %v3795_v16  ;;  %3019 = vmatprep.subr.bf16.mxu0 %v3384_v0  ;;  %v1360_v15 = vpack.c.bf16 %v3800_v20, %v3800_v20  ;;  %3027 = vmatprep.subr.bf16.mxu1 %v3384_v0 }
 0x312   :  { %3008 = vmatmul.mubr.msk.bf16.vlgmr.msra.gmra.mrb[44].mxu0 %vm592_vm3, %v1359_v22  ;;  %3016 = vmatmul.mubr.msk.bf16.vlgmr.msra.gmra.mrb[44].mxu1 %vm592_vm3, %v1360_v15 }
 0x313   :  { %3023 = vmatprep.mubr.msk.bf16.mxu0 %vm3385_vm0, %v3384_v0  ;;  %3031 = vmatprep.mubr.msk.bf16.mxu1 %vm3385_vm0, %v3384_v0 }
 0x314   :  { %3020 = vmatpush3.bf16.msra.mxu0 %v3172_v18  ;;  %3028 = vmatpush3.bf16.msra.mxu1 %v3173_v23 }
 0x315   :  { %3021 = vmatprep.subr.bf16.mxu0 %v3384_v0  ;;  %3029 = vmatprep.subr.bf16.mxu1 %v3384_v0 }
 0x318   :  { %3022 = vmatpush3.bf16.msra.mxu0 %v3174_v24  ;;  %3030 = vmatpush3.bf16.msra.mxu1 %v3175_v25  ;;  %v3184_v25 = vld [vmem:[#allocation11] sm:$0xff]  }
 0x319   :  { %3035 = vmatprep.subr.bf16.mxu0 %v3384_v0  ;;  %3043 = vmatprep.subr.bf16.mxu1 %v3384_v0 }
 0x3d5   :  { %v1446_v28 = vpop.f32.mrb[36].mxu0  ;;  %v1501_v30 = vpop.f32.mrb[36].mxu1 }
 0x3d6   :  { %v1447_v29 = vadd.f32 %v2665_v26, %v1446_v28  ;;  %v2977_v31 = vpop.f32.mrb[37].mxu0  ;;  %v1502_v32 = vadd.f32 %v2666_v27, %v1501_v30  ;;  %v2985_v33 = vpop.f32.mrb[37].mxu1  ;;  %v3185_v26 = vld [vmem:[#allocation11 + $0x10] sm:$0xff]   ;;  %v3186_v27 = vld [vmem:[#allocation11 + $0x8] sm:$0xff]   ;;  %v3187_v28 = vld [vmem:[#allocation11 + $0x18] sm:$0xff]  }
 0x3d7   :  { %v1449_v34 = vpop.f32.mrb[38].mxu0  ;;  %v1504_v36 = vpop.f32.mrb[38].mxu1  ;;  %v2690_v30 = vld [vmem:[%s3959_s10 + $0x1] ss:$0 sm:$0xff] }
 0x3d8   :  { %v1727_v35 = vmax.f32 %v1447_v29, 0.0  ;;  %v2978_v37 = vpop.f32.mrb[39].mxu0  ;;  %v1728_v40 = vmax.f32 %v1502_v32, 0.0  ;;  %v2986_v42 = vpop.f32.mrb[39].mxu1  ;;  %v2689_v29 = vld [vmem:[%s3959_s10] ss:$0 sm:$0xff] }
 0x3da   :  { %v1763_v45 = vpack.c.bf16 %v1727_v35, %v1727_v35  ;;  %v1764_v47 = vpack.c.bf16 %v1728_v40, %v1728_v40 }
 0x3dc   :  { %3024 = vmatmul.mubr.msk.bf16.vlgmr.msra.gmra.mrb[48].mxu0 %vm592_vm3, %v1763_v45  ;;  %3032 = vmatmul.mubr.msk.bf16.vlgmr.msra.gmra.mrb[48].mxu1 %vm592_vm3, %v1764_v47 }
 0x3dd   :  { %v1556_v38 = vpop.f32.mrb[40].mxu0  ;;  %3036 = vmatpush3.bf16.msra.mxu0 %v3176_v44  ;;  %v1611_v51 = vpop.f32.mrb[40].mxu1  ;;  %3044 = vmatpush3.bf16.msra.mxu1 %v3177_v46 }
 0x3de   :  { %v1557_v50 = vadd.f32 %v2667_v48, %v1556_v38  ;;  %v2993_v52 = vpop.f32.mrb[41].mxu0  ;;  %3037 = vmatprep.subr.bf16.mxu0 %v3384_v0  ;;  %v1612_v54 = vadd.f32 %v2668_v49, %v1611_v51  ;;  %v3001_v55 = vpop.f32.mrb[41].mxu1  ;;  %3045 = vmatprep.subr.bf16.mxu1 %v3384_v0  ;;  %v2691_v49 = vld [vmem:[%s3959_s10 + $0x2] ss:$0 sm:$0xff]  ;;  %v3188_v38 = vld [vmem:[#allocation11 + $0x20] sm:$0xff]   ;;  %v3189_v51 = vld [vmem:[#allocation11 + $0x30] sm:$0xff]  }
 0x3df   :  { %v1559_v56 = vpop.f32.mrb[42].mxu0  ;;  %3039 = vmatprep.mubr.msk.bf16.mxu0 %vm3385_vm0, %v3384_v0  ;;  %v1614_v60 = vpop.f32.mrb[42].mxu1  ;;  %3047 = vmatprep.mubr.msk.bf16.mxu1 %vm3385_vm0, %v3384_v0 }
 0x3e0   :  { %v1729_v57 = vmax.f32 %v1557_v50, 0.0  ;;  %v2994_v62 = vpop.f32.mrb[43].mxu0  ;;  %v1730_v1 = vmax.f32 %v1612_v54, 0.0  ;;  %v3002_v2 = vpop.f32.mrb[43].mxu1  ;;  %v2692_v50 = vld [vmem:[%s3959_s10 + $0x3] ss:$0 sm:$0xff] }
 0x3e1   :  { %3038 = vmatpush3.bf16.msra.mxu0 %v3178_v41  ;;  %3046 = vmatpush3.bf16.msra.mxu1 %v3179_v53  ;;  %v3190_v60 = vld [vmem:[#allocation11 + $0x28] sm:$0xff]  }
 0x3e2   :  { %v1765_v4 = vpack.c.bf16 %v1729_v57, %v1729_v57  ;;  %3051 = vmatprep.subr.bf16.mxu0 %v3384_v0  ;;  %v1766_v61 = vpack.c.bf16 %v1730_v1, %v1730_v1  ;;  %3059 = vmatprep.subr.bf16.mxu1 %v3384_v0 }
 0x3e4   :  { %3040 = vmatmul.mubr.msk.bf16.vlgmr.msra.gmra.mrb[52].mxu0 %vm592_vm3, %v1765_v4  ;;  %3048 = vmatmul.mubr.msk.bf16.vlgmr.msra.gmra.mrb[52].mxu1 %vm592_vm3, %v1766_v61 }
 0x3e5   :  { %v1666_v7 = vpop.f32.mrb[44].mxu0  ;;  %3052 = vmatpush3.bf16.msra.mxu0 %v3180_v3  ;;  %v1721_v10 = vpop.f32.mrb[44].mxu1  ;;  %3060 = vmatpush3.bf16.msra.mxu1 %v3181_v58  ;;  %v3191_v3 = vld [vmem:[#allocation11 + $0x38] sm:$0xff]  }
 0x3e6   :  { %v1667_v9 = vadd.f32 %v2669_v5, %v1666_v7  ;;  %v3009_v11 = vpop.f32.mrb[45].mxu0  ;;  %3053 = vmatprep.subr.bf16.mxu0 %v3384_v0  ;;  %v1722_v13 = vadd.f32 %v2670_v6, %v1721_v10  ;;  %v3017_v14 = vpop.f32.mrb[45].mxu1  ;;  %3061 = vmatprep.subr.bf16.mxu1 %v3384_v0  ;;  %v3192_v6 = vld [vmem:[#allocation11 + $0x40] sm:$0xff]  }
 0x3e7   :  { %v1669_v17 = vpop.f32.mrb[46].mxu0  ;;  %3055 = vmatprep.mubr.msk.bf16.mxu0 %vm3385_vm0, %v3384_v0  ;;  %v1724_v21 = vpop.f32.mrb[46].mxu1  ;;  %3063 = vmatprep.mubr.msk.bf16.mxu1 %vm3385_vm0, %v3384_v0 }
 0x3e8   :  { %v1731_v19 = vmax.f32 %v1667_v9, 0.0  ;;  %v3010_v22 = vpop.f32.mrb[47].mxu0  ;;  %v1732_v15 = vmax.f32 %v1722_v13, 0.0  ;;  %v3018_v18 = vpop.f32.mrb[47].mxu1  ;;  %v3194_v21 = vld [vmem:[#allocation11 + $0x48] sm:$0xff]  }
 0x3e9   :  { %3054 = vmatpush3.bf16.msra.mxu0 %v3182_v8  ;;  %3062 = vmatpush3.bf16.msra.mxu1 %v3183_v12  ;;  %v3193_v8 = vld [vmem:[#allocation11 + $0x50] sm:$0xff]  }
 0x3ea   :  { %v1767_v23 = vpack.c.bf16 %v1731_v19, %v1731_v19  ;;  %3067 = vmatprep.subr.bf16.mxu0 %v3384_v0  ;;  %v1768_v24 = vpack.c.bf16 %v1732_v15, %v1732_v15  ;;  %3075 = vmatprep.subr.bf16.mxu1 %v3384_v0 }
 0x3ec   :  { %3056 = vmatmul.mubr.msk.bf16.vlgmr.msra.gmra.mrb[56].mxu0 %vm592_vm3, %v1767_v23  ;;  %3064 = vmatmul.mubr.msk.bf16.vlgmr.msra.gmra.mrb[56].mxu1 %vm592_vm3, %v1768_v24  ;;  %v3195_v23 = vld [vmem:[#allocation11 + $0x58] sm:$0xff]  }
 0x3ed   :  { %3071 = vmatprep.mubr.msk.bf16.mxu0 %vm3385_vm0, %v3384_v0  ;;  %3079 = vmatprep.mubr.msk.bf16.mxu1 %vm3385_vm0, %v3384_v0 }
 0x3ee   :  { %3068 = vmatpush3.bf16.msra.mxu0 %v3184_v25  ;;  %3076 = vmatpush3.bf16.msra.mxu1 %v3185_v26 }
 0x3ef   :  { %3069 = vmatprep.subr.bf16.mxu0 %v3384_v0  ;;  %3077 = vmatprep.subr.bf16.mxu1 %v3384_v0 }
 0x3f2   :  { %3070 = vmatpush3.bf16.msra.mxu0 %v3186_v27  ;;  %3078 = vmatpush3.bf16.msra.mxu1 %v3187_v28 }
 0x3f3   :  { %3083 = vmatprep.subr.bf16.mxu0 %v3384_v0  ;;  %3091 = vmatprep.subr.bf16.mxu1 %v3384_v0 }
 0x4af   :  { %v1854_v31 = vpop.f32.mrb[48].mxu0  ;;  %v1909_v33 = vpop.f32.mrb[48].mxu1 }
 0x4b0   :  { %v1855_v32 = vadd.f32 %v2689_v29, %v1854_v31  ;;  %v3025_v34 = vpop.f32.mrb[49].mxu0  ;;  %v1910_v35 = vadd.f32 %v2690_v30, %v1909_v33  ;;  %v3033_v36 = vpop.f32.mrb[49].mxu1  ;;  %v2714_v29 = vld [vmem:[%s3961_s12 + $0x1] ss:$0 sm:$0xff] }
 0x4b1   :  { %v1857_v37 = vpop.f32.mrb[50].mxu0  ;;  %v1912_v42 = vpop.f32.mrb[50].mxu1 }
 0x4b2   :  { %v2135_v40 = vadd.f32 %v1855_v32, %v3747_v39  ;;  %v3026_v44 = vpop.f32.mrb[51].mxu0  ;;  %v2136_v45 = vadd.f32 %v1910_v35, %v3750_v43  ;;  %v3034_v46 = vpop.f32.mrb[51].mxu1 }
 0x4b3   :  { %v2716_v46 = vld [vmem:[%s3961_s12 + $0x3] ss:$0 sm:$0xff] }
 0x4b4   :  { %v2141_v47 = vmax.f32 %v2135_v40, 0.0  ;;  %v2142_v48 = vmax.f32 %v2136_v45, 0.0  ;;  %v2715_v45 = vld [vmem:[%s3961_s12 + $0x2] ss:$0 sm:$0xff] }
 0x4b6   :  { %v2177_v41 = vpack.c.bf16 %v2141_v47, %v2141_v47  ;;  %v2178_v52 = vpack.c.bf16 %v2142_v48, %v2142_v48 }
 0x4b7   :  { %v1964_v39 = vpop.f32.mrb[52].mxu0  ;;  %v2019_v54 = vpop.f32.mrb[52].mxu1 }
 0x4b8   :  { %v1965_v53 = vadd.f32 %v2691_v49, %v1964_v39  ;;  %v3041_v55 = vpop.f32.mrb[53].mxu0  ;;  %3072 = vmatmul.mubr.msk.bf16.vlgmr.msra.gmra.mrb[60].mxu0 %vm592_vm3, %v2177_v41  ;;  %v2020_v43 = vadd.f32 %v2692_v50, %v2019_v54  ;;  %v3049_v56 = vpop.f32.mrb[53].mxu1  ;;  %3080 = vmatmul.mubr.msk.bf16.vlgmr.msra.gmra.mrb[60].mxu1 %vm592_vm3, %v2178_v52 }
 0x4b9   :  { %v1967_v57 = vpop.f32.mrb[54].mxu0  ;;  %3084 = vmatpush3.bf16.msra.mxu0 %v3188_v38  ;;  %v2022_v1 = vpop.f32.mrb[54].mxu1  ;;  %3092 = vmatpush3.bf16.msra.mxu1 %v3189_v51 }
 0x4ba   :  { %v2137_v62 = vadd.f32 %v1965_v53, %v3769_v59  ;;  %v3042_v2 = vpop.f32.mrb[55].mxu0  ;;  %3085 = vmatprep.subr.bf16.mxu0 %v3384_v0  ;;  %v2138_v4 = vadd.f32 %v2020_v43, %v3774_v63  ;;  %v3050_v58 = vpop.f32.mrb[55].mxu1  ;;  %3093 = vmatprep.subr.bf16.mxu1 %v3384_v0  ;;  %v2693_v59 = vld [vmem:[%s3959_s10 + $0x4] ss:$0 sm:$0xff]  ;;  %v2694_v63 = vld [vmem:[%s3959_s10 + $0x5] ss:$0 sm:$0xff] }
 0x4bb   :  { %3087 = vmatprep.mubr.msk.bf16.mxu0 %vm3385_vm0, %v3384_v0  ;;  %3095 = vmatprep.mubr.msk.bf16.mxu1 %vm3385_vm0, %v3384_v0  ;;  %v2717_v43 = vld [vmem:[%s3961_s12 + $0x4] ss:$0 sm:$0xff]  ;;  %v2718_v57 = vld [vmem:[%s3961_s12 + $0x5] ss:$0 sm:$0xff] }
 0x4bc   :  { %v2143_v61 = vmax.f32 %v2137_v62, 0.0  ;;  %v2144_v5 = vmax.f32 %v2138_v4, 0.0 }
 0x4bd   :  { %3086 = vmatpush3.bf16.msra.mxu0 %v3190_v60  ;;  %3094 = vmatpush3.bf16.msra.mxu1 %v3191_v3 }
 0x4be   :  { %v2179_v7 = vpack.c.bf16 %v2143_v61, %v2143_v61  ;;  %3099 = vmatprep.subr.bf16.mxu0 %v3384_v0  ;;  %v2180_v9 = vpack.c.bf16 %v2144_v5, %v2144_v5  ;;  %3107 = vmatprep.subr.bf16.mxu1 %v3384_v0 }
 0x4bf   :  { %v2074_v10 = vpop.f32.mrb[56].mxu0  ;;  %v2129_v12 = vpop.f32.mrb[56].mxu1 }
 0x4c0   :  { %v2075_v11 = vadd.f32 %v2693_v59, %v2074_v10  ;;  %v3057_v13 = vpop.f32.mrb[57].mxu0  ;;  %3088 = vmatmul.mubr.msk.bf16.vlgmr.msra.gmra.mrb[64].mxu0 %vm592_vm3, %v2179_v7  ;;  %v2130_v14 = vadd.f32 %v2694_v63, %v2129_v12  ;;  %v3065_v17 = vpop.f32.mrb[57].mxu1  ;;  %3096 = vmatmul.mubr.msk.bf16.vlgmr.msra.gmra.mrb[64].mxu1 %vm592_vm3, %v2180_v9 }
 0x4c1   :  { %v2077_v19 = vpop.f32.mrb[58].mxu0  ;;  %3100 = vmatpush3.bf16.msra.mxu0 %v3192_v6  ;;  %v2132_v15 = vpop.f32.mrb[58].mxu1  ;;  %3108 = vmatpush3.bf16.msra.mxu1 %v3193_v8 }
 0x4c2   :  { %v2139_v22 = vadd.f32 %v2075_v11, %v3795_v16  ;;  %v3058_v18 = vpop.f32.mrb[59].mxu0  ;;  %3101 = vmatprep.subr.bf16.mxu0 %v3384_v0  ;;  %v2140_v24 = vadd.f32 %v2130_v14, %v3800_v20  ;;  %v3066_v25 = vpop.f32.mrb[59].mxu1  ;;  %3109 = vmatprep.subr.bf16.mxu1 %v3384_v0  ;;  %v2713_v20 = vld [vmem:[%s3961_s12] ss:$0 sm:$0xff]  ;;  %s3386_s12 = smov [#allocation13]  }
 0x4c3   :  { %3103 = vmatprep.mubr.msk.bf16.mxu0 %vm3385_vm0, %v3384_v0  ;;  %3111 = vmatprep.mubr.msk.bf16.mxu1 %vm3385_vm0, %v3384_v0  ;;  %s2584_s19 = sshll.u32 %s3386_s12, 4  ;;  %s2585_s19 = int_to_ptr.vmem [resolvable:$true] %s2584_s19 }
 0x4c4   :  { %v2145_v26 = vmax.f32 %v2139_v22, 0.0  ;;  %v2146_v27 = vmax.f32 %v2140_v24, 0.0  ;;  %s3340_s11 = scalar_lea.vmem %s2585_s19, 768  ;;  %p3345_p7 = scmp.lt.s32.totalorder %s2585_s19, %s2585_s19 }
 0x4c5   :  { %3102 = vmatpush3.bf16.msra.mxu0 %v3194_v21  ;;  %3110 = vmatpush3.bf16.msra.mxu1 %v3195_v23  ;;  %p3341_p6 = scmp.ne.s32.totalorder %s2585_s19, %s3340_s11  ;;  %p3346_p8 = scmp.lt.s32.totalorder %s3340_s11, %s3340_s11 }
 0x4c6   :  { %v2181_v16 = vpack.c.bf16 %v2145_v26, %v2145_v26  ;;  %v2182_v28 = vpack.c.bf16 %v2146_v27, %v2146_v27 }
 0x4c7   :  { %p3347_p9 = por %p3346_p8, %p3345_p7 }
 0x4c8   :  { %3104 = vmatmul.mubr.msk.bf16.vlgmr.msra.gmra.mrb[68].mxu0 %vm592_vm3, %v2181_v16  ;;  %3112 = vmatmul.mubr.msk.bf16.vlgmr.msra.gmra.mrb[68].mxu1 %vm592_vm3, %v2182_v28 }
 0x4c9   :  { %p3348_p10 = pnand %p3347_p9, %p3341_p6 }
 0x58b   :  { %v2268_v30 = vpop.f32.mrb[60].mxu0  ;;  %v2323_v0 = vpop.f32.mrb[60].mxu1 }
 0x58c   :  { %v2269_v31 = vadd.f32 %v2713_v20, %v2268_v30  ;;  %v3073_v32 = vpop.f32.mrb[61].mxu0  ;;  %v2324_v33 = vadd.f32 %v2714_v29, %v2323_v0  ;;  %v3081_v34 = vpop.f32.mrb[61].mxu1 }
 0x58d   :  { %v2271_v35 = vpop.f32.mrb[62].mxu0  ;;  %v2326_v37 = vpop.f32.mrb[62].mxu1 }
 0x58e   :  { %v2549_v36 = vmul.f32 0.5, %v2269_v31  ;;  %v3074_v40 = vpop.f32.mrb[63].mxu0  ;;  %v2550_v42 = vmul.f32 0.5, %v2324_v33  ;;  %v3082_v44 = vpop.f32.mrb[63].mxu1 }
 0x590   :  { %3196 = vtanh.f32 %v2549_v36 }
 0x591   :  { %3198 = vtanh.f32 %v2550_v42 }
 0x593   :  { %v2378_v47 = vpop.f32.mrb[64].mxu0  ;;  %v2433_v49 = vpop.f32.mrb[64].mxu1 }
 0x594   :  { %v2379_v48 = vadd.f32 %v2715_v45, %v2378_v47  ;;  %v3089_v38 = vpop.f32.mrb[65].mxu0  ;;  %v2434_v41 = vadd.f32 %v2716_v46, %v2433_v49  ;;  %v3097_v50 = vpop.f32.mrb[65].mxu1 }
 0x595   :  { %v2381_v51 = vpop.f32.mrb[66].mxu0  ;;  %v2436_v39 = vpop.f32.mrb[66].mxu1 }
 0x596   :  { %v2551_v52 = vmul.f32 0.5, %v2379_v48  ;;  %v3090_v53 = vpop.f32.mrb[67].mxu0  ;;  %v2552_v54 = vmul.f32 0.5, %v2434_v41  ;;  %v3098_v55 = vpop.f32.mrb[67].mxu1 }
 0x598   :  { %3200 = vtanh.f32 %v2551_v52 }
 0x599   :  { %3202 = vtanh.f32 %v2552_v54 }
 0x59a   :  { %v3197_v56 = vpop.eup %3196 }
 0x59b   :  { %v3199_v60 = vpop.eup %3198  ;;  %v2561_v62 = vmul.f32 0.5, %v3197_v56  ;;  %v2488_v1 = vpop.f32.mrb[68].mxu0 }
 0x59c   :  { %v2562_v2 = vmul.f32 0.5, %v3199_v60  ;;  %v2489_v3 = vadd.f32 %v2717_v43, %v2488_v1  ;;  %v2543_v4 = vpop.f32.mrb[68].mxu1  ;;  %v3105_v58 = vpop.f32.mrb[69].mxu0 }
 0x59d   :  { %v2567_v61 = vadd.f32 0.5, %v2561_v62  ;;  %v2544_v5 = vadd.f32 %v2718_v57, %v2543_v4  ;;  %v3113_v59 = vpop.f32.mrb[69].mxu1  ;;  %v2491_v6 = vpop.f32.mrb[70].mxu0 }
 0x59e   :  { %v2568_v7 = vadd.f32 0.5, %v2562_v2  ;;  %v2553_v63 = vmul.f32 0.5, %v2489_v3  ;;  %v2546_v8 = vpop.f32.mrb[70].mxu1  ;;  %v3106_v9 = vpop.f32.mrb[71].mxu0 }
 0x59f   :  { %2573 = vst.msk [vmem:[#allocation13] sm:$0xff] %vm592_vm3, %v2567_v61  ;;  %v2554_v10 = vmul.f32 0.5, %v2544_v5  ;;  %v3114_v11 = vpop.f32.mrb[71].mxu1 }
 0x5a0   :  { %2574 = vst.msk [vmem:[#allocation13 + $0x8] sm:$0xff] %vm592_vm3, %v2568_v7  ;;  %3204 = vtanh.f32 %v2553_v63 }
 0x5a1   :  { %3206 = vtanh.f32 %v2554_v10 }
 0x5a2   :  { %v3201_v12 = vpop.eup %3200 }
 0x5a3   :  { %v3203_v13 = vpop.eup %3202  ;;  %v2563_v14 = vmul.f32 0.5, %v3201_v12 }
 0x5a4   :  { %v2564_v17 = vmul.f32 0.5, %v3203_v13 }
 0x5a5   :  { %v2569_v19 = vadd.f32 0.5, %v2563_v14 }
 0x5a6   :  { %v2570_v21 = vadd.f32 0.5, %v2564_v17 }
 0x5a7   :  { %2575 = vst.msk [vmem:[#allocation13 + $0x10] sm:$0xff] %vm592_vm3, %v2569_v19 }
 0x5a8   :  { %2576 = vst.msk [vmem:[#allocation13 + $0x18] sm:$0xff] %vm592_vm3, %v2570_v21 }
 0x5aa   :  { %v3205_v22 = vpop.eup %3204 }
 0x5ab   :  { %v3207_v15 = vpop.eup %3206  ;;  %v2565_v18 = vmul.f32 0.5, %v3205_v22 }
 0x5ac   :  { %v2566_v23 = vmul.f32 0.5, %v3207_v15 }
 0x5ad   :  { %v2571_v24 = vadd.f32 0.5, %v2565_v18 }
 0x5ae   :  { %v2572_v25 = vadd.f32 0.5, %v2566_v23 }
 0x5af   :  { %2577 = vst.msk [vmem:[#allocation13 + $0x20] sm:$0xff] %vm592_vm3, %v2571_v24 }
 0x5b0   :  { %2578 = vst.msk [vmem:[#allocation13 + $0x28] sm:$0xff] %vm592_vm3, %v2572_v25 }
 0x5b1   :  { %3351 = shalt.err (!%p3348_p10)
}
 0x5b2   :  { %s3352_s17 = scalar_lea.hbm %s3962_s13, 768 }
 0x5b3   :  { %p3353_p11 = scmp.ne.s32.totalorder %s3962_s13, %s3352_s17  ;;  %p3356_p12 = scmp.lt.u32.totalorder %s3352_s17, %s3962_s13 }
 0x5b5   :  { %p3358_p13 = pnand %p3356_p12, %p3353_p11 }
 0x5b7   :  { %3361 = shalt.err (!%p3358_p13)
}
 0x5b8   :  { %2590 = dma.vmem_to_hbm [thread:$0]  %s2585_s19, 768, %s3962_s13, [#allocation4], %s3379_s7, %s3379_s7, %s3380_s23  }
 0x5b9   :  { %3370 = dma.done.wait [#allocation4], 768  }
 0x5ba   :  { %3371 = vsyncadd [#allocation4], 4294966528 }
 0x5bb   :  { %2594 = vsyncpa [#allocation3], 1 }
 0x5bc   :  { %2595 = vsyncpa [#allocation6], 1 }
 0x5bd   :  { %2596 = vsyncpa [#allocation9], 1 }
 0x5be   :  { %2597 = vsyncpa [#allocation12], 1 }
 0x5bf   :  { %2598 = vsyncpa [#allocation4], 1 }

</bundles_post_ra>
